<compile_context>
chip_gen: v7x
topology: tpu7x:2x2x1
jax: 0.10.0
libtpu: 0.0.40
codegen_flags: <defaults>
</compile_context>

<pallas_src>
import math

import jax
import jax.numpy as jnp
from jax import lax
from jax.experimental import pallas as pl
from jax.experimental.pallas import tpu as pltpu

# ----------------------------- config ---------------------------------------
B = 2            # batch
LQ = 8           # query length
LP = 7           # passage length
S = LQ + 1 + LP  # total sequence = 16  (query + [SEP] + passage)
BS = B * S       # flattened rows resident in the kernel = 32
H = 32           # hidden size
NH = 2           # attention heads
DH = H // NH     # head dim = 16
FF = 64          # FFN intermediate size
NLAYERS = 2
VOCAB = 128
MAXPOS = 32
SEP_TOKEN_ID = 102
LN_EPS = 1e-12
MASK_BIAS = -10000.0   # HF BERT additive mask value; exp() underflows to 0 in f32

_LOG2_S = S.bit_length() - 1
assert (1 << _LOG2_S) == S, "block-diagonal mask uses a shift; S must be a power of 2"

# ---- packed-slab row offsets (all static Python ints) ----
# wide slab: 128 lanes
_W_LAYER = 2 * H                      # rows per layer: [wqkvo(32) ; w1|w2T(32)]
_W_SCORE = NLAYERS * _W_LAYER         # 128: score_w replicated (32,128)
_W_MISC = _W_SCORE + H                # 160: per-layer [b_qkvo ; b_ff1] rows
_W_SCOREB = _W_MISC + 2 * NLAYERS     # 164: score_b broadcast row
WIDE_ROWS = ((_W_SCOREB + 1 + 7) // 8) * 8      # 168
# narrow slab: 32 lanes (= H)
_N_POS = VOCAB                        # 128: tiled (pos+type) addend (BS,H)
_N_EMBLN = VOCAB + BS                 # 160: emb LN gamma, beta
_N_LN = _N_EMBLN + 2                  # 162: per-layer [ln1g,ln1b,ln2g,ln2b,b_ff2]
NARROW_ROWS = ((_N_LN + 5 * NLAYERS + 7) // 8) * 8   # 176


# ----------------------------- in-kernel math helpers ------------------------
def _ln_fused(x, g, b):
    # one-pass stats: the two cross-lane (XLU) reductions are independent.
    m1 = jnp.mean(x, axis=-1, keepdims=True)
    m2 = jnp.mean(x * x, axis=-1, keepdims=True)
    var = jnp.maximum(m2 - m1 * m1, 0.0)
    return (x - m1) * lax.rsqrt(var + LN_EPS) * g + b


def _erf_kernel(x):
    # Abramowitz & Stegun 7.1.26 (|error| < 1.5e-7); divide replaced by EUP approx recip.
    a1, a2, a3, a4, a5 = 0.254829592, -0.284496736, 1.421413741, -1.453152027, 1.061405429
    p = 0.3275911
    sgn = jnp.where(x >= 0.0, 1.0, -1.0)
    ax = jnp.abs(x)
    t = pl.reciprocal(1.0 + p * ax, approx=True)
    poly = ((((a5 * t + a4) * t + a3) * t + a2) * t + a1) * t
    return sgn * (1.0 - poly * jnp.exp(-ax * ax))


def _gelu_kernel(x):
    # Exact-erf GELU (matches HF BERT's default "gelu").
    return 0.5 * x * (1.0 + _erf_kernel(x * 0.7071067811865476))


# ----------------------------- fused kernel ----------------------------------
def fused_reranker_kernel(ids_ref, mask_ref, wide_ref, narrow_ref, o_ref):
    f32 = jnp.float32

    # ---- embedding gather via one-hot matmul (VOCAB = 128 lanes) ----
    ids = ids_ref[...]                                            # (BS, 1) int32
    vocab_iota = lax.broadcasted_iota(jnp.int32, (BS, VOCAB), 1)
    onehot = (vocab_iota == ids).astype(f32)                      # (BS, VOCAB)
    tok = jnp.dot(onehot, narrow_ref[0:VOCAB, :],
                  preferred_element_type=f32)                     # (BS, H)
    emb = tok + narrow_ref[_N_POS:_N_POS + BS, :]                 # + (pos + type[0]) addend

    # ---- embedding LayerNorm ----
    x = _ln_fused(emb, narrow_ref[_N_EMBLN:_N_EMBLN + 1, :],
                  narrow_ref[_N_EMBLN + 1:_N_EMBLN + 2, :])       # (BS, H)

    # ---- additive attention bias: key-padding + block-diagonal batch mask ----
    row_i = lax.broadcasted_iota(jnp.int32, (BS, BS), 0)
    col_j = lax.broadcasted_iota(jnp.int32, (BS, BS), 1)
    same = jnp.right_shift(row_i, _LOG2_S) == jnp.right_shift(col_j, _LOG2_S)
    bias = jnp.where(same, 0.0, MASK_BIAS) + (mask_ref[...] - 1.0) * 10000.0   # (BS, BS)

    # ---- transformer encoder layers (statically unrolled) ----
    for l in range(NLAYERS):
        wbase = l * _W_LAYER
        wqkvo = wide_ref[wbase:wbase + H, :]                      # (H, 4H) [Wq*s|Wk|Wv|Wo]
        ffw = wide_ref[wbase + H:wbase + 2 * H, :]                # (H, 128) [W1 | W2^T]
        b_qkvo = wide_ref[_W_MISC + 2 * l:_W_MISC + 2 * l + 1, :]            # (1, 128)
        b_ff1 = wide_ref[_W_MISC + 2 * l + 1:_W_MISC + 2 * l + 2, 0:FF]      # (1, 64)
        nb = _N_LN + 5 * l
        ln1g = narrow_ref[nb + 0:nb + 1, :]
        ln1b = narrow_ref[nb + 1:nb + 2, :]
        ln2g = narrow_ref[nb + 2:nb + 3, :]
        ln2b = narrow_ref[nb + 3:nb + 4, :]
        b_ff2 = narrow_ref[nb + 4:nb + 5, :]

        # single lane-dense MXU pass: (BS, H) @ (H, 4H)
        xw = jnp.dot(x, wqkvo, preferred_element_type=f32) + b_qkvo
        q = xw[:, 0 * H:1 * H]        # scale 1/sqrt(DH) folded into Wq/bq at pack time
        k = xw[:, 1 * H:2 * H]
        v = xw[:, 2 * H:3 * H]
        wo = wqkvo[:, 3 * H:4 * H]    # (H, H)

        attn = jnp.zeros((BS, H), dtype=f32)
        for h in range(NH):           # static unroll; no .T, no concatenate
            hs = slice(h * DH, (h + 1) * DH)
            s = lax.dot_general(q[:, hs], k[:, hs], (((1,), (1,)), ((), ())),
                                preferred_element_type=f32) + bias
            s = s - jnp.max(s, axis=-1, keepdims=True)
            p = jnp.exp(s)
            p = p * pl.reciprocal(jnp.sum(p, axis=-1, keepdims=True), approx=True)
            ctx = jnp.dot(p, v[:, hs], preferred_element_type=f32)          # (BS, DH)
            attn = attn + jnp.dot(ctx, wo[hs, :], preferred_element_type=f32)
        attn = attn + b_qkvo[:, 3 * H:4 * H]

        h1 = _ln_fused(x + attn, ln1g, ln1b)
        ff = jnp.dot(h1, ffw[:, 0:FF], preferred_element_type=f32) + b_ff1
        ff = _gelu_kernel(ff)
        ff = lax.dot_general(ff, ffw[:, FF:2 * FF], (((1,), (1,)), ((), ())),
                             preferred_element_type=f32) + b_ff2
        x = _ln_fused(h1 + ff, ln2g, ln2b)

    # ---- score head over ALL rows: lane-dense (BS, 128) output, no row gather ----
    score_w = wide_ref[_W_SCORE:_W_SCORE + H, :]                  # (H, 128) replicated
    score_b = wide_ref[_W_SCOREB:_W_SCOREB + 1, :]                # (1, 128)
    o_ref[...] = jnp.dot(x, score_w, preferred_element_type=f32) + score_b


# ----------------------------- pallas_call wrapper ---------------------------
def fused_forward(ids_col, mask_row, wide, narrow):
    # No grid: single invocation, whole-array VMEM blocks, no double-buffering.
    vmem = pl.BlockSpec(memory_space=pltpu.MemorySpace.VMEM)
    return pl.pallas_call(
        fused_reranker_kernel,
        out_shape=jax.ShapeDtypeStruct((BS, 128), jnp.float32),
        in_specs=[vmem, vmem, vmem, vmem],
        out_specs=vmem,
    )(ids_col, mask_row, wide, narrow)


# ----------------------------- parameters ------------------------------------
def init_params(key):
    """Deterministic mini-BERT weights in HF-style (unpacked) layout."""
    def normal(k, shape):
        return 0.02 * jax.random.normal(k, shape, dtype=jnp.float32)

    keys = iter(jax.random.split(key, 64))
    ones = jnp.ones((1, H), jnp.float32)
    zeros = jnp.zeros((1, H), jnp.float32)
    params = {
        "word_emb": normal(next(keys), (VOCAB, H)),
        "pos_emb": normal(next(keys), (MAXPOS, H)),
        "type_emb": normal(next(keys), (2, H)),
        "emb_ln_g": ones, "emb_ln_b": zeros,
        "layers": [],
        "score_w": normal(next(keys), (H, 1)),
        "score_b": jnp.zeros((1, 1), jnp.float32),
    }
    for _ in range(NLAYERS):
        params["layers"].append({
            "wq": normal(next(keys), (H, H)), "bq": zeros,
            "wk": normal(next(keys), (H, H)), "bk": zeros,
            "wv": normal(next(keys), (H, H)), "bv": zeros,
            "wo": normal(next(keys), (H, H)), "bo": zeros,
            "ln1g": ones, "ln1b": zeros,
            "w1": normal(next(keys), (H, FF)), "b1": jnp.zeros((1, FF), jnp.float32),
            "w2": normal(next(keys), (FF, H)), "b2": zeros,
            "ln2g": ones, "ln2b": zeros,
        })
    return params


def prepare_model(params):
    """Pack all weights into two lane-dense VMEM slabs consumed by the fused kernel."""
    scale = 1.0 / math.sqrt(DH)     # fold the attention scale into Wq / bq (free)

    wide = jnp.zeros((WIDE_ROWS, 128), jnp.float32)
    narrow = jnp.zeros((NARROW_ROWS, H), jnp.float32)

    for l, L in enumerate(params["layers"]):
        wqkvo = jnp.concatenate([L["wq"] * scale, L["wk"], L["wv"], L["wo"]], axis=1)  # (H,128)
        ffw = jnp.concatenate([L["w1"], L["w2"].T], axis=1)                            # (H,128)
        b_qkvo = jnp.concatenate([L["bq"] * scale, L["bk"], L["bv"], L["bo"]], axis=1) # (1,128)
        wbase = l * _W_LAYER
        wide = wide.at[wbase:wbase + H, :].set(wqkvo)
        wide = wide.at[wbase + H:wbase + 2 * H, :].set(ffw)
        wide = wide.at[_W_MISC + 2 * l, :].set(b_qkvo[0])
        wide = wide.at[_W_MISC + 2 * l + 1, 0:FF].set(L["b1"][0])

        nb = _N_LN + 5 * l
        narrow = narrow.at[nb + 0, :].set(L["ln1g"][0])
        narrow = narrow.at[nb + 1, :].set(L["ln1b"][0])
        narrow = narrow.at[nb + 2, :].set(L["ln2g"][0])
        narrow = narrow.at[nb + 3, :].set(L["ln2b"][0])
        narrow = narrow.at[nb + 4, :].set(L["b2"][0])

    wide = wide.at[_W_SCORE:_W_SCORE + H, :].set(jnp.tile(params["score_w"], (1, 128)))
    wide = wide.at[_W_SCOREB, :].set(jnp.full((128,), params["score_b"][0, 0], jnp.float32))

    narrow = narrow.at[0:VOCAB, :].set(params["word_emb"])
    pos_type = params["pos_emb"][:S] + params["type_emb"][0][None, :]   # token_type_ids == 0
    narrow = narrow.at[_N_POS:_N_POS + BS, :].set(jnp.tile(pos_type, (B, 1)))
    narrow = narrow.at[_N_EMBLN, :].set(params["emb_ln_g"][0])
    narrow = narrow.at[_N_EMBLN + 1, :].set(params["emb_ln_b"][0])

    return {"wide": wide, "narrow": narrow}


# ----------------------------- forward ----------------------------------------
@jax.jit
def cross_attention_reranker(model, query_ids, query_mask, passage_ids, passage_mask):
    # [SEP] insertion + mask concat + reshapes stay as trivial wrapper ops; everything
    # downstream (gather, bias build, LN, 2 layers, score head) is one Pallas call.
    sep = jnp.full((query_ids.shape[0], 1), SEP_TOKEN_ID, dtype=query_ids.dtype)
    input_ids = jnp.concatenate([query_ids, sep, passage_ids], axis=1)              # (B, S)
    attn_mask = jnp.concatenate(
        [query_mask, jnp.ones_like(sep, dtype=query_mask.dtype), passage_mask],
        axis=1).astype(jnp.float32)                                                  # (B, S)
    ids_col = input_ids.reshape(BS, 1).astype(jnp.int32)
    mask_row = attn_mask.reshape(1, BS)
    out = fused_forward(ids_col, mask_row, model["wide"], model["narrow"])           # (BS, 128)
    return out[0::S, 0:1]                                                            # (B, 1)


# ----------------------------- pure-JAX reference ------------------------------
def _ln_ref(x, g, b):
    mu = jnp.mean(x, axis=-1, keepdims=True)
    var = jnp.mean((x - mu) ** 2, axis=-1, keepdims=True)
    return (x - mu) * lax.rsqrt(var + LN_EPS) * g + b


def reference_forward(params, query_ids, query_mask, passage_ids, passage_mask):
    """Straightforward per-batch BERT forward (no Pallas) for correctness checks."""
    sep = jnp.full((query_ids.shape[0], 1), SEP_TOKEN_ID, dtype=query_ids.dtype)
    input_ids = jnp.concatenate([query_ids, sep, passage_ids], axis=1)
    mask = jnp.concatenate(
        [query_mask, jnp.ones_like(sep, dtype=query_mask.dtype), passage_mask],
        axis=1).astype(jnp.float32)
    tok = jnp.take(params["word_emb"], input_ids, axis=0)
    emb = tok + params["pos_emb"][:S][None, :, :] + params["type_emb"][0][None, None, :]

    x = _ln_ref(emb, params["emb_ln_g"], params["emb_ln_b"])             # (B, S, H)
    bias = ((mask - 1.0) * 10000.0)[:, None, None, :]                    # (B, 1, 1, S)
    scale = 1.0 / math.sqrt(DH)
    for L in params["layers"]:
        q = x @ L["wq"] + L["bq"]
        k = x @ L["wk"] + L["bk"]
        v = x @ L["wv"] + L["bv"]
        qh = q.reshape(B, S, NH, DH).transpose(0, 2, 1, 3)
        kh = k.reshape(B, S, NH, DH).transpose(0, 2, 1, 3)
        vh = v.reshape(B, S, NH, DH).transpose(0, 2, 1, 3)
        s = jnp.einsum("bhqd,bhkd->bhqk", qh, kh) * scale + bias
        p = jax.nn.softmax(s, axis=-1)
        ctx = jnp.einsum("bhqk,bhkd->bhqd", p, vh).transpose(0, 2, 1, 3).reshape(B, S, H)
        attn = ctx @ L["wo"] + L["bo"]
        h1 = _ln_ref(x + attn, L["ln1g"], L["ln1b"])
        ff = h1 @ L["w1"] + L["b1"]
        ff = 0.5 * ff * (1.0 + jax.scipy.special.erf(ff * 0.7071067811865476))
        ff = ff @ L["w2"] + L["b2"]
        x = _ln_ref(h1 + ff, L["ln2g"], L["ln2b"])
    cls = x[:, 0, :]
    return cls @ params["score_w"] + params["score_b"]


# ----------------------------- main --------------------------------------------
if __name__ == "__main__":
    key = jax.random.PRNGKey(0)
    k_param, k_q, k_p = jax.random.split(key, 3)

    params = init_params(k_param)
    model = prepare_model(params)

    query_ids = jax.random.randint(k_q, (B, LQ), 0, VOCAB, dtype=jnp.int32)
    passage_ids = jax.random.randint(k_p, (B, LP), 0, VOCAB, dtype=jnp.int32)

    # masks: mostly ones, with a few padded (zero) trailing positions
    query_mask = jnp.ones((B, LQ), jnp.float32).at[:, -2:].set(
        jnp.array([[1.0, 0.0], [0.0, 0.0]], jnp.float32))
    passage_mask = jnp.ones((B, LP), jnp.float32).at[1, -1].set(0.0)

    score = cross_attention_reranker(model, query_ids, query_mask,
                                     passage_ids, passage_mask)
    jax.block_until_ready(score)
    assert score.shape == (B, 1) and score.dtype == jnp.float32

    ref = reference_forward(params, query_ids, query_mask, passage_ids, passage_mask)
    max_err = float(jnp.max(jnp.abs(score - ref)))
    assert max_err < 2e-2, f"kernel vs reference mismatch: max|diff|={max_err}"

    print("KERNEL_OK")
</pallas_src>

<mosaic_0001>
module attributes {stable_mosaic.version = 11 : i64} {
  func.func @fused_reranker_kernel(%arg0: memref<32x1xi32, #tpu.memory_space<vmem>>, %arg1: memref<1x32xf32, #tpu.memory_space<vmem>>, %arg2: memref<168x128xf32, #tpu.memory_space<vmem>>, %arg3: memref<176x32xf32, #tpu.memory_space<vmem>>, %arg4: memref<32x128xf32, #tpu.memory_space<vmem>>) attributes {dimension_semantics = [], scalar_prefetch = 0 : i64, scratch_operands = 0 : i64, tpu.core_type = #tpu.core_type<tc>} {
    %c0 = arith.constant 0 : index
    %c0_0 = arith.constant 0 : index
    %0 = vector.load %arg0[%c0, %c0_0] : memref<32x1xi32, #tpu.memory_space<vmem>>, vector<32x1xi32>
    %1 = tpu.iota {dimensions = array<i32: 1>} : vector<32x128xi32>
    %2 = vector.broadcast %0 : vector<32x1xi32> to vector<32x128xi32>
    %3 = arith.cmpi eq, %1, %2 : vector<32x128xi32>
    %4 = arith.extui %3 : vector<32x128xi1> to vector<32x128xi32>
    %5 = arith.sitofp %4 : vector<32x128xi32> to vector<32x128xf32>
    %c0_1 = arith.constant 0 : index
    %c0_2 = arith.constant 0 : index
    %6 = vector.load %arg3[%c0_1, %c0_2] : memref<176x32xf32, #tpu.memory_space<vmem>>, vector<128x32xf32>
    %cst = arith.constant dense<0.000000e+00> : vector<32x32xf32>
    %7 = tpu.matmul %5, %6, %cst {dimension_numbers = #tpu.dot_dimension_numbers<[1], [0], [0], [1], [0, 0, 1, 1], [], []>} : vector<32x128xf32>, vector<128x32xf32>, vector<32x32xf32> -> vector<32x32xf32>
    %c128 = arith.constant 128 : index
    %c0_3 = arith.constant 0 : index
    %8 = vector.load %arg3[%c128, %c0_3] : memref<176x32xf32, #tpu.memory_space<vmem>>, vector<32x32xf32>
    %9 = arith.addf %7, %8 : vector<32x32xf32>
    %c160 = arith.constant 160 : index
    %c0_4 = arith.constant 0 : index
    %10 = vector.load %arg3[%c160, %c0_4] : memref<176x32xf32, #tpu.memory_space<vmem>>, vector<1x32xf32>
    %c161 = arith.constant 161 : index
    %c0_5 = arith.constant 0 : index
    %11 = vector.load %arg3[%c161, %c0_5] : memref<176x32xf32, #tpu.memory_space<vmem>>, vector<1x32xf32>
    %cst_6 = arith.constant dense<0.000000e+00> : vector<32xf32>
    %12 = vector.multi_reduction <add>, %9, %cst_6 [1] : vector<32x32xf32> to vector<32xf32>
    %13 = vector.shape_cast %12 : vector<32xf32> to vector<32x1xf32>
    %cst_7 = arith.constant 3.200000e+01 : f32
    %14 = vector.broadcast %cst_7 : f32 to vector<32x1xf32>
    %15 = arith.divf %13, %14 : vector<32x1xf32>
    %16 = arith.mulf %9, %9 : vector<32x32xf32>
    %cst_8 = arith.constant dense<0.000000e+00> : vector<32xf32>
    %17 = vector.multi_reduction <add>, %16, %cst_8 [1] : vector<32x32xf32> to vector<32xf32>
    %18 = vector.shape_cast %17 : vector<32xf32> to vector<32x1xf32>
    %cst_9 = arith.constant 3.200000e+01 : f32
    %19 = vector.broadcast %cst_9 : f32 to vector<32x1xf32>
    %20 = arith.divf %18, %19 : vector<32x1xf32>
    %21 = arith.mulf %15, %15 : vector<32x1xf32>
    %22 = arith.subf %20, %21 : vector<32x1xf32>
    %cst_10 = arith.constant 0.000000e+00 : f32
    %23 = vector.broadcast %cst_10 : f32 to vector<32x1xf32>
    %24 = arith.maximumf %22, %23 : vector<32x1xf32>
    %25 = vector.broadcast %15 : vector<32x1xf32> to vector<32x32xf32>
    %26 = arith.subf %9, %25 : vector<32x32xf32>
    %cst_11 = arith.constant 9.99999996E-13 : f32
    %27 = vector.broadcast %cst_11 : f32 to vector<32x1xf32>
    %28 = arith.addf %24, %27 : vector<32x1xf32>
    %29 = math.rsqrt %28 : vector<32x1xf32>
    %30 = vector.broadcast %29 : vector<32x1xf32> to vector<32x32xf32>
    %31 = arith.mulf %26, %30 : vector<32x32xf32>
    %32 = vector.broadcast %10 : vector<1x32xf32> to vector<32x32xf32>
    %33 = arith.mulf %31, %32 : vector<32x32xf32>
    %34 = vector.broadcast %11 : vector<1x32xf32> to vector<32x32xf32>
    %35 = arith.addf %33, %34 : vector<32x32xf32>
    %36 = tpu.iota {dimensions = array<i32: 0>} : vector<32x32xi32>
    %37 = tpu.iota {dimensions = array<i32: 1>} : vector<32x32xi32>
    %c4_i32 = arith.constant 4 : i32
    %38 = vector.broadcast %c4_i32 : i32 to vector<32x32xi32>
    %39 = arith.shrsi %36, %38 : vector<32x32xi32>
    %c4_i32_12 = arith.constant 4 : i32
    %40 = vector.broadcast %c4_i32_12 : i32 to vector<32x32xi32>
    %41 = arith.shrsi %37, %40 : vector<32x32xi32>
    %42 = arith.cmpi eq, %39, %41 : vector<32x32xi32>
    %cst_13 = arith.constant 0.000000e+00 : f32
    %cst_14 = arith.constant -1.000000e+04 : f32
    %43 = vector.broadcast %cst_13 : f32 to vector<32x32xf32>
    %44 = vector.broadcast %cst_14 : f32 to vector<32x32xf32>
    %45 = arith.select %42, %43, %44 : vector<32x32xi1>, vector<32x32xf32>
    %c0_15 = arith.constant 0 : index
    %c0_16 = arith.constant 0 : index
    %46 = vector.load %arg1[%c0_15, %c0_16] : memref<1x32xf32, #tpu.memory_space<vmem>>, vector<1x32xf32>
    %cst_17 = arith.constant 1.000000e+00 : f32
    %47 = vector.broadcast %cst_17 : f32 to vector<1x32xf32>
    %48 = arith.subf %46, %47 : vector<1x32xf32>
    %cst_18 = arith.constant 1.000000e+04 : f32
    %49 = vector.broadcast %cst_18 : f32 to vector<1x32xf32>
    %50 = arith.mulf %48, %49 : vector<1x32xf32>
    %51 = vector.broadcast %50 : vector<1x32xf32> to vector<32x32xf32>
    %52 = arith.addf %45, %51 : vector<32x32xf32>
    %c0_19 = arith.constant 0 : index
    %c0_20 = arith.constant 0 : index
    %53 = vector.load %arg2[%c0_19, %c0_20] : memref<168x128xf32, #tpu.memory_space<vmem>>, vector<32x128xf32>
    %c32 = arith.constant 32 : index
    %c0_21 = arith.constant 0 : index
    %54 = vector.load %arg2[%c32, %c0_21] : memref<168x128xf32, #tpu.memory_space<vmem>>, vector<32x128xf32>
    %c160_22 = arith.constant 160 : index
    %c0_23 = arith.constant 0 : index
    %55 = vector.load %arg2[%c160_22, %c0_23] : memref<168x128xf32, #tpu.memory_space<vmem>>, vector<1x128xf32>
    %c161_24 = arith.constant 161 : index
    %c0_25 = arith.constant 0 : index
    %56 = vector.load %arg2[%c161_24, %c0_25] : memref<168x128xf32, #tpu.memory_space<vmem>>, vector<1x64xf32>
    %c162 = arith.constant 162 : index
    %c0_26 = arith.constant 0 : index
    %57 = vector.load %arg3[%c162, %c0_26] : memref<176x32xf32, #tpu.memory_space<vmem>>, vector<1x32xf32>
    %c163 = arith.constant 163 : index
    %c0_27 = arith.constant 0 : index
    %58 = vector.load %arg3[%c163, %c0_27] : memref<176x32xf32, #tpu.memory_space<vmem>>, vector<1x32xf32>
    %c164 = arith.constant 164 : index
    %c0_28 = arith.constant 0 : index
    %59 = vector.load %arg3[%c164, %c0_28] : memref<176x32xf32, #tpu.memory_space<vmem>>, vector<1x32xf32>
    %c165 = arith.constant 165 : index
    %c0_29 = arith.constant 0 : index
    %60 = vector.load %arg3[%c165, %c0_29] : memref<176x32xf32, #tpu.memory_space<vmem>>, vector<1x32xf32>
    %c166 = arith.constant 166 : index
    %c0_30 = arith.constant 0 : index
    %61 = vector.load %arg3[%c166, %c0_30] : memref<176x32xf32, #tpu.memory_space<vmem>>, vector<1x32xf32>
    %cst_31 = arith.constant dense<0.000000e+00> : vector<32x128xf32>
    %62 = tpu.matmul %35, %53, %cst_31 {dimension_numbers = #tpu.dot_dimension_numbers<[1], [0], [0], [1], [0, 0, 1, 1], [], []>} : vector<32x32xf32>, vector<32x128xf32>, vector<32x128xf32> -> vector<32x128xf32>
    %63 = vector.broadcast %55 : vector<1x128xf32> to vector<32x128xf32>
    %64 = arith.addf %62, %63 : vector<32x128xf32>
    %65 = vector.extract_strided_slice %64 {offsets = [0, 0], sizes = [32, 32], strides = [1, 1]} : vector<32x128xf32> to vector<32x32xf32>
    %66 = vector.extract_strided_slice %64 {offsets = [0, 32], sizes = [32, 32], strides = [1, 1]} : vector<32x128xf32> to vector<32x32xf32>
    %67 = vector.extract_strided_slice %64 {offsets = [0, 64], sizes = [32, 32], strides = [1, 1]} : vector<32x128xf32> to vector<32x32xf32>
    %68 = vector.extract_strided_slice %53 {offsets = [0, 96], sizes = [32, 32], strides = [1, 1]} : vector<32x128xf32> to vector<32x32xf32>
    %cst_32 = arith.constant 0.000000e+00 : f32
    %69 = vector.broadcast %cst_32 : f32 to vector<32x32xf32>
    %70 = vector.extract_strided_slice %65 {offsets = [0, 0], sizes = [32, 16], strides = [1, 1]} : vector<32x32xf32> to vector<32x16xf32>
    %71 = vector.extract_strided_slice %66 {offsets = [0, 0], sizes = [32, 16], strides = [1, 1]} : vector<32x32xf32> to vector<32x16xf32>
    %cst_33 = arith.constant dense<0.000000e+00> : vector<32x32xf32>
    %72 = tpu.matmul %70, %71, %cst_33 {dimension_numbers = #tpu.dot_dimension_numbers<[1], [1], [0], [0], [0, 0, 1, 0], [], []>} : vector<32x16xf32>, vector<32x16xf32>, vector<32x32xf32> -> vector<32x32xf32>
    %73 = arith.addf %72, %52 : vector<32x32xf32>
    %cst_34 = arith.constant dense<0xFF800000> : vector<32xf32>
    %74 = vector.multi_reduction <maximumf>, %73, %cst_34 [1] : vector<32x32xf32> to vector<32xf32>
    %75 = vector.shape_cast %74 : vector<32xf32> to vector<32x1xf32>
    %76 = vector.broadcast %75 : vector<32x1xf32> to vector<32x32xf32>
    %77 = arith.subf %73, %76 : vector<32x32xf32>
    %78 = math.exp %77 : vector<32x32xf32>
    %cst_35 = arith.constant dense<0.000000e+00> : vector<32xf32>
    %79 = vector.multi_reduction <add>, %78, %cst_35 [1] : vector<32x32xf32> to vector<32xf32>
    %80 = vector.shape_cast %79 : vector<32xf32> to vector<32x1xf32>
    %81 = tpu.reciprocal %80 {approx = true} : vector<32x1xf32> -> vector<32x1xf32>
    %82 = vector.broadcast %81 : vector<32x1xf32> to vector<32x32xf32>
    %83 = arith.mulf %78, %82 : vector<32x32xf32>
    %84 = vector.extract_strided_slice %67 {offsets = [0, 0], sizes = [32, 16], strides = [1, 1]} : vector<32x32xf32> to vector<32x16xf32>
    %cst_36 = arith.constant dense<0.000000e+00> : vector<32x16xf32>
    %85 = tpu.matmul %83, %84, %cst_36 {dimension_numbers = #tpu.dot_dimension_numbers<[1], [0], [0], [1], [0, 0, 1, 1], [], []>} : vector<32x32xf32>, vector<32x16xf32>, vector<32x16xf32> -> vector<32x16xf32>
    %86 = vector.extract_strided_slice %68 {offsets = [0, 0], sizes = [16, 32], strides = [1, 1]} : vector<32x32xf32> to vector<16x32xf32>
    %cst_37 = arith.constant dense<0.000000e+00> : vector<32x32xf32>
    %87 = tpu.matmul %85, %86, %cst_37 {dimension_numbers = #tpu.dot_dimension_numbers<[1], [0], [0], [1], [0, 0, 1, 1], [], []>} : vector<32x16xf32>, vector<16x32xf32>, vector<32x32xf32> -> vector<32x32xf32>
    %88 = arith.addf %69, %87 : vector<32x32xf32>
    %89 = vector.extract_strided_slice %65 {offsets = [0, 16], sizes = [32, 16], strides = [1, 1]} : vector<32x32xf32> to vector<32x16xf32>
    %90 = vector.extract_strided_slice %66 {offsets = [0, 16], sizes = [32, 16], strides = [1, 1]} : vector<32x32xf32> to vector<32x16xf32>
    %cst_38 = arith.constant dense<0.000000e+00> : vector<32x32xf32>
    %91 = tpu.matmul %89, %90, %cst_38 {dimension_numbers = #tpu.dot_dimension_numbers<[1], [1], [0], [0], [0, 0, 1, 0], [], []>} : vector<32x16xf32>, vector<32x16xf32>, vector<32x32xf32> -> vector<32x32xf32>
    %92 = arith.addf %91, %52 : vector<32x32xf32>
    %cst_39 = arith.constant dense<0xFF800000> : vector<32xf32>
    %93 = vector.multi_reduction <maximumf>, %92, %cst_39 [1] : vector<32x32xf32> to vector<32xf32>
    %94 = vector.shape_cast %93 : vector<32xf32> to vector<32x1xf32>
    %95 = vector.broadcast %94 : vector<32x1xf32> to vector<32x32xf32>
    %96 = arith.subf %92, %95 : vector<32x32xf32>
    %97 = math.exp %96 : vector<32x32xf32>
    %cst_40 = arith.constant dense<0.000000e+00> : vector<32xf32>
    %98 = vector.multi_reduction <add>, %97, %cst_40 [1] : vector<32x32xf32> to vector<32xf32>
    %99 = vector.shape_cast %98 : vector<32xf32> to vector<32x1xf32>
    %100 = tpu.reciprocal %99 {approx = true} : vector<32x1xf32> -> vector<32x1xf32>
    %101 = vector.broadcast %100 : vector<32x1xf32> to vector<32x32xf32>
    %102 = arith.mulf %97, %101 : vector<32x32xf32>
    %103 = vector.extract_strided_slice %67 {offsets = [0, 16], sizes = [32, 16], strides = [1, 1]} : vector<32x32xf32> to vector<32x16xf32>
    %cst_41 = arith.constant dense<0.000000e+00> : vector<32x16xf32>
    %104 = tpu.matmul %102, %103, %cst_41 {dimension_numbers = #tpu.dot_dimension_numbers<[1], [0], [0], [1], [0, 0, 1, 1], [], []>} : vector<32x32xf32>, vector<32x16xf32>, vector<32x16xf32> -> vector<32x16xf32>
    %105 = vector.extract_strided_slice %68 {offsets = [16, 0], sizes = [16, 32], strides = [1, 1]} : vector<32x32xf32> to vector<16x32xf32>
    %cst_42 = arith.constant dense<0.000000e+00> : vector<32x32xf32>
    %106 = tpu.matmul %104, %105, %cst_42 {dimension_numbers = #tpu.dot_dimension_numbers<[1], [0], [0], [1], [0, 0, 1, 1], [], []>} : vector<32x16xf32>, vector<16x32xf32>, vector<32x32xf32> -> vector<32x32xf32>
    %107 = arith.addf %88, %106 : vector<32x32xf32>
    %108 = vector.extract_strided_slice %55 {offsets = [0, 96], sizes = [1, 32], strides = [1, 1]} : vector<1x128xf32> to vector<1x32xf32>
    %109 = vector.broadcast %108 : vector<1x32xf32> to vector<32x32xf32>
    %110 = arith.addf %107, %109 : vector<32x32xf32>
    %111 = arith.addf %35, %110 : vector<32x32xf32>
    %cst_43 = arith.constant dense<0.000000e+00> : vector<32xf32>
    %112 = vector.multi_reduction <add>, %111, %cst_43 [1] : vector<32x32xf32> to vector<32xf32>
    %113 = vector.shape_cast %112 : vector<32xf32> to vector<32x1xf32>
    %cst_44 = arith.constant 3.200000e+01 : f32
    %114 = vector.broadcast %cst_44 : f32 to vector<32x1xf32>
    %115 = arith.divf %113, %114 : vector<32x1xf32>
    %116 = arith.mulf %111, %111 : vector<32x32xf32>
    %cst_45 = arith.constant dense<0.000000e+00> : vector<32xf32>
    %117 = vector.multi_reduction <add>, %116, %cst_45 [1] : vector<32x32xf32> to vector<32xf32>
    %118 = vector.shape_cast %117 : vector<32xf32> to vector<32x1xf32>
    %cst_46 = arith.constant 3.200000e+01 : f32
    %119 = vector.broadcast %cst_46 : f32 to vector<32x1xf32>
    %120 = arith.divf %118, %119 : vector<32x1xf32>
    %121 = arith.mulf %115, %115 : vector<32x1xf32>
    %122 = arith.subf %120, %121 : vector<32x1xf32>
    %cst_47 = arith.constant 0.000000e+00 : f32
    %123 = vector.broadcast %cst_47 : f32 to vector<32x1xf32>
    %124 = arith.maximumf %122, %123 : vector<32x1xf32>
    %125 = vector.broadcast %115 : vector<32x1xf32> to vector<32x32xf32>
    %126 = arith.subf %111, %125 : vector<32x32xf32>
    %cst_48 = arith.constant 9.99999996E-13 : f32
    %127 = vector.broadcast %cst_48 : f32 to vector<32x1xf32>
    %128 = arith.addf %124, %127 : vector<32x1xf32>
    %129 = math.rsqrt %128 : vector<32x1xf32>
    %130 = vector.broadcast %129 : vector<32x1xf32> to vector<32x32xf32>
    %131 = arith.mulf %126, %130 : vector<32x32xf32>
    %132 = vector.broadcast %57 : vector<1x32xf32> to vector<32x32xf32>
    %133 = arith.mulf %131, %132 : vector<32x32xf32>
    %134 = vector.broadcast %58 : vector<1x32xf32> to vector<32x32xf32>
    %135 = arith.addf %133, %134 : vector<32x32xf32>
    %136 = vector.extract_strided_slice %54 {offsets = [0, 0], sizes = [32, 64], strides = [1, 1]} : vector<32x128xf32> to vector<32x64xf32>
    %cst_49 = arith.constant dense<0.000000e+00> : vector<32x64xf32>
    %137 = tpu.matmul %135, %136, %cst_49 {dimension_numbers = #tpu.dot_dimension_numbers<[1], [0], [0], [1], [0, 0, 1, 1], [], []>} : vector<32x32xf32>, vector<32x64xf32>, vector<32x64xf32> -> vector<32x64xf32>
    %138 = vector.broadcast %56 : vector<1x64xf32> to vector<32x64xf32>
    %139 = arith.addf %137, %138 : vector<32x64xf32>
    %cst_50 = arith.constant 5.000000e-01 : f32
    %140 = vector.broadcast %cst_50 : f32 to vector<32x64xf32>
    %141 = arith.mulf %140, %139 : vector<32x64xf32>
    %cst_51 = arith.constant 0.707106769 : f32
    %142 = vector.broadcast %cst_51 : f32 to vector<32x64xf32>
    %143 = arith.mulf %139, %142 : vector<32x64xf32>
    %cst_52 = arith.constant 0.000000e+00 : f32
    %144 = vector.broadcast %cst_52 : f32 to vector<32x64xf32>
    %145 = arith.cmpf oge, %143, %144 : vector<32x64xf32>
    %cst_53 = arith.constant 1.000000e+00 : f32
    %cst_54 = arith.constant -1.000000e+00 : f32
    %146 = vector.broadcast %cst_53 : f32 to vector<32x64xf32>
    %147 = vector.broadcast %cst_54 : f32 to vector<32x64xf32>
    %148 = arith.select %145, %146, %147 : vector<32x64xi1>, vector<32x64xf32>
    %149 = math.absf %143 : vector<32x64xf32>
    %cst_55 = arith.constant 0.327591091 : f32
    %150 = vector.broadcast %cst_55 : f32 to vector<32x64xf32>
    %151 = arith.mulf %150, %149 : vector<32x64xf32>
    %cst_56 = arith.constant 1.000000e+00 : f32
    %152 = vector.broadcast %cst_56 : f32 to vector<32x64xf32>
    %153 = arith.addf %152, %151 : vector<32x64xf32>
    %154 = tpu.reciprocal %153 {approx = true} : vector<32x64xf32> -> vector<32x64xf32>
    %cst_57 = arith.constant 1.06140542 : f32
    %155 = vector.broadcast %cst_57 : f32 to vector<32x64xf32>
    %156 = arith.mulf %155, %154 : vector<32x64xf32>
    %cst_58 = arith.constant -1.45315206 : f32
    %157 = vector.broadcast %cst_58 : f32 to vector<32x64xf32>
    %158 = arith.addf %156, %157 : vector<32x64xf32>
    %159 = arith.mulf %158, %154 : vector<32x64xf32>
    %cst_59 = arith.constant 1.42141378 : f32
    %160 = vector.broadcast %cst_59 : f32 to vector<32x64xf32>
    %161 = arith.addf %159, %160 : vector<32x64xf32>
    %162 = arith.mulf %161, %154 : vector<32x64xf32>
    %cst_60 = arith.constant -0.284496725 : f32
    %163 = vector.broadcast %cst_60 : f32 to vector<32x64xf32>
    %164 = arith.addf %162, %163 : vector<32x64xf32>
    %165 = arith.mulf %164, %154 : vector<32x64xf32>
    %cst_61 = arith.constant 0.254829586 : f32
    %166 = vector.broadcast %cst_61 : f32 to vector<32x64xf32>
    %167 = arith.addf %165, %166 : vector<32x64xf32>
    %168 = arith.mulf %167, %154 : vector<32x64xf32>
    %cst_62 = arith.constant 0.000000e+00 : f32
    %169 = vector.broadcast %cst_62 : f32 to vector<32x64xf32>
    %170 = arith.subf %169, %149 : vector<32x64xf32>
    %171 = arith.mulf %170, %149 : vector<32x64xf32>
    %172 = math.exp %171 : vector<32x64xf32>
    %173 = arith.mulf %168, %172 : vector<32x64xf32>
    %cst_63 = arith.constant 1.000000e+00 : f32
    %174 = vector.broadcast %cst_63 : f32 to vector<32x64xf32>
    %175 = arith.subf %174, %173 : vector<32x64xf32>
    %176 = arith.mulf %148, %175 : vector<32x64xf32>
    %cst_64 = arith.constant 1.000000e+00 : f32
    %177 = vector.broadcast %cst_64 : f32 to vector<32x64xf32>
    %178 = arith.addf %177, %176 : vector<32x64xf32>
    %179 = arith.mulf %141, %178 : vector<32x64xf32>
    %180 = vector.extract_strided_slice %54 {offsets = [0, 64], sizes = [32, 64], strides = [1, 1]} : vector<32x128xf32> to vector<32x64xf32>
    %cst_65 = arith.constant dense<0.000000e+00> : vector<32x32xf32>
    %181 = tpu.matmul %179, %180, %cst_65 {dimension_numbers = #tpu.dot_dimension_numbers<[1], [1], [0], [0], [0, 0, 1, 0], [], []>} : vector<32x64xf32>, vector<32x64xf32>, vector<32x32xf32> -> vector<32x32xf32>
    %182 = vector.broadcast %61 : vector<1x32xf32> to vector<32x32xf32>
    %183 = arith.addf %181, %182 : vector<32x32xf32>
    %184 = arith.addf %135, %183 : vector<32x32xf32>
    %cst_66 = arith.constant dense<0.000000e+00> : vector<32xf32>
    %185 = vector.multi_reduction <add>, %184, %cst_66 [1] : vector<32x32xf32> to vector<32xf32>
    %186 = vector.shape_cast %185 : vector<32xf32> to vector<32x1xf32>
    %cst_67 = arith.constant 3.200000e+01 : f32
    %187 = vector.broadcast %cst_67 : f32 to vector<32x1xf32>
    %188 = arith.divf %186, %187 : vector<32x1xf32>
    %189 = arith.mulf %184, %184 : vector<32x32xf32>
    %cst_68 = arith.constant dense<0.000000e+00> : vector<32xf32>
    %190 = vector.multi_reduction <add>, %189, %cst_68 [1] : vector<32x32xf32> to vector<32xf32>
    %191 = vector.shape_cast %190 : vector<32xf32> to vector<32x1xf32>
    %cst_69 = arith.constant 3.200000e+01 : f32
    %192 = vector.broadcast %cst_69 : f32 to vector<32x1xf32>
    %193 = arith.divf %191, %192 : vector<32x1xf32>
    %194 = arith.mulf %188, %188 : vector<32x1xf32>
    %195 = arith.subf %193, %194 : vector<32x1xf32>
    %cst_70 = arith.constant 0.000000e+00 : f32
    %196 = vector.broadcast %cst_70 : f32 to vector<32x1xf32>
    %197 = arith.maximumf %195, %196 : vector<32x1xf32>
    %198 = vector.broadcast %188 : vector<32x1xf32> to vector<32x32xf32>
    %199 = arith.subf %184, %198 : vector<32x32xf32>
    %cst_71 = arith.constant 9.99999996E-13 : f32
    %200 = vector.broadcast %cst_71 : f32 to vector<32x1xf32>
    %201 = arith.addf %197, %200 : vector<32x1xf32>
    %202 = math.rsqrt %201 : vector<32x1xf32>
    %203 = vector.broadcast %202 : vector<32x1xf32> to vector<32x32xf32>
    %204 = arith.mulf %199, %203 : vector<32x32xf32>
    %205 = vector.broadcast %59 : vector<1x32xf32> to vector<32x32xf32>
    %206 = arith.mulf %204, %205 : vector<32x32xf32>
    %207 = vector.broadcast %60 : vector<1x32xf32> to vector<32x32xf32>
    %208 = arith.addf %206, %207 : vector<32x32xf32>
    %c64 = arith.constant 64 : index
    %c0_72 = arith.constant 0 : index
    %209 = vector.load %arg2[%c64, %c0_72] : memref<168x128xf32, #tpu.memory_space<vmem>>, vector<32x128xf32>
    %c96 = arith.constant 96 : index
    %c0_73 = arith.constant 0 : index
    %210 = vector.load %arg2[%c96, %c0_73] : memref<168x128xf32, #tpu.memory_space<vmem>>, vector<32x128xf32>
    %c162_74 = arith.constant 162 : index
    %c0_75 = arith.constant 0 : index
    %211 = vector.load %arg2[%c162_74, %c0_75] : memref<168x128xf32, #tpu.memory_space<vmem>>, vector<1x128xf32>
    %c163_76 = arith.constant 163 : index
    %c0_77 = arith.constant 0 : index
    %212 = vector.load %arg2[%c163_76, %c0_77] : memref<168x128xf32, #tpu.memory_space<vmem>>, vector<1x64xf32>
    %c167 = arith.constant 167 : index
    %c0_78 = arith.constant 0 : index
    %213 = vector.load %arg3[%c167, %c0_78] : memref<176x32xf32, #tpu.memory_space<vmem>>, vector<1x32xf32>
    %c168 = arith.constant 168 : index
    %c0_79 = arith.constant 0 : index
    %214 = vector.load %arg3[%c168, %c0_79] : memref<176x32xf32, #tpu.memory_space<vmem>>, vector<1x32xf32>
    %c169 = arith.constant 169 : index
    %c0_80 = arith.constant 0 : index
    %215 = vector.load %arg3[%c169, %c0_80] : memref<176x32xf32, #tpu.memory_space<vmem>>, vector<1x32xf32>
    %c170 = arith.constant 170 : index
    %c0_81 = arith.constant 0 : index
    %216 = vector.load %arg3[%c170, %c0_81] : memref<176x32xf32, #tpu.memory_space<vmem>>, vector<1x32xf32>
    %c171 = arith.constant 171 : index
    %c0_82 = arith.constant 0 : index
    %217 = vector.load %arg3[%c171, %c0_82] : memref<176x32xf32, #tpu.memory_space<vmem>>, vector<1x32xf32>
    %cst_83 = arith.constant dense<0.000000e+00> : vector<32x128xf32>
    %218 = tpu.matmul %208, %209, %cst_83 {dimension_numbers = #tpu.dot_dimension_numbers<[1], [0], [0], [1], [0, 0, 1, 1], [], []>} : vector<32x32xf32>, vector<32x128xf32>, vector<32x128xf32> -> vector<32x128xf32>
    %219 = vector.broadcast %211 : vector<1x128xf32> to vector<32x128xf32>
    %220 = arith.addf %218, %219 : vector<32x128xf32>
    %221 = vector.extract_strided_slice %220 {offsets = [0, 0], sizes = [32, 32], strides = [1, 1]} : vector<32x128xf32> to vector<32x32xf32>
    %222 = vector.extract_strided_slice %220 {offsets = [0, 32], sizes = [32, 32], strides = [1, 1]} : vector<32x128xf32> to vector<32x32xf32>
    %223 = vector.extract_strided_slice %220 {offsets = [0, 64], sizes = [32, 32], strides = [1, 1]} : vector<32x128xf32> to vector<32x32xf32>
    %224 = vector.extract_strided_slice %209 {offsets = [0, 96], sizes = [32, 32], strides = [1, 1]} : vector<32x128xf32> to vector<32x32xf32>
    %cst_84 = arith.constant 0.000000e+00 : f32
    %225 = vector.broadcast %cst_84 : f32 to vector<32x32xf32>
    %226 = vector.extract_strided_slice %221 {offsets = [0, 0], sizes = [32, 16], strides = [1, 1]} : vector<32x32xf32> to vector<32x16xf32>
    %227 = vector.extract_strided_slice %222 {offsets = [0, 0], sizes = [32, 16], strides = [1, 1]} : vector<32x32xf32> to vector<32x16xf32>
    %cst_85 = arith.constant dense<0.000000e+00> : vector<32x32xf32>
    %228 = tpu.matmul %226, %227, %cst_85 {dimension_numbers = #tpu.dot_dimension_numbers<[1], [1], [0], [0], [0, 0, 1, 0], [], []>} : vector<32x16xf32>, vector<32x16xf32>, vector<32x32xf32> -> vector<32x32xf32>
    %229 = arith.addf %228, %52 : vector<32x32xf32>
    %cst_86 = arith.constant dense<0xFF800000> : vector<32xf32>
    %230 = vector.multi_reduction <maximumf>, %229, %cst_86 [1] : vector<32x32xf32> to vector<32xf32>
    %231 = vector.shape_cast %230 : vector<32xf32> to vector<32x1xf32>
    %232 = vector.broadcast %231 : vector<32x1xf32> to vector<32x32xf32>
    %233 = arith.subf %229, %232 : vector<32x32xf32>
    %234 = math.exp %233 : vector<32x32xf32>
    %cst_87 = arith.constant dense<0.000000e+00> : vector<32xf32>
    %235 = vector.multi_reduction <add>, %234, %cst_87 [1] : vector<32x32xf32> to vector<32xf32>
    %236 = vector.shape_cast %235 : vector<32xf32> to vector<32x1xf32>
    %237 = tpu.reciprocal %236 {approx = true} : vector<32x1xf32> -> vector<32x1xf32>
    %238 = vector.broadcast %237 : vector<32x1xf32> to vector<32x32xf32>
    %239 = arith.mulf %234, %238 : vector<32x32xf32>
    %240 = vector.extract_strided_slice %223 {offsets = [0, 0], sizes = [32, 16], strides = [1, 1]} : vector<32x32xf32> to vector<32x16xf32>
    %cst_88 = arith.constant dense<0.000000e+00> : vector<32x16xf32>
    %241 = tpu.matmul %239, %240, %cst_88 {dimension_numbers = #tpu.dot_dimension_numbers<[1], [0], [0], [1], [0, 0, 1, 1], [], []>} : vector<32x32xf32>, vector<32x16xf32>, vector<32x16xf32> -> vector<32x16xf32>
    %242 = vector.extract_strided_slice %224 {offsets = [0, 0], sizes = [16, 32], strides = [1, 1]} : vector<32x32xf32> to vector<16x32xf32>
    %cst_89 = arith.constant dense<0.000000e+00> : vector<32x32xf32>
    %243 = tpu.matmul %241, %242, %cst_89 {dimension_numbers = #tpu.dot_dimension_numbers<[1], [0], [0], [1], [0, 0, 1, 1], [], []>} : vector<32x16xf32>, vector<16x32xf32>, vector<32x32xf32> -> vector<32x32xf32>
    %244 = arith.addf %225, %243 : vector<32x32xf32>
    %245 = vector.extract_strided_slice %221 {offsets = [0, 16], sizes = [32, 16], strides = [1, 1]} : vector<32x32xf32> to vector<32x16xf32>
    %246 = vector.extract_strided_slice %222 {offsets = [0, 16], sizes = [32, 16], strides = [1, 1]} : vector<32x32xf32> to vector<32x16xf32>
    %cst_90 = arith.constant dense<0.000000e+00> : vector<32x32xf32>
    %247 = tpu.matmul %245, %246, %cst_90 {dimension_numbers = #tpu.dot_dimension_numbers<[1], [1], [0], [0], [0, 0, 1, 0], [], []>} : vector<32x16xf32>, vector<32x16xf32>, vector<32x32xf32> -> vector<32x32xf32>
    %248 = arith.addf %247, %52 : vector<32x32xf32>
    %cst_91 = arith.constant dense<0xFF800000> : vector<32xf32>
    %249 = vector.multi_reduction <maximumf>, %248, %cst_91 [1] : vector<32x32xf32> to vector<32xf32>
    %250 = vector.shape_cast %249 : vector<32xf32> to vector<32x1xf32>
    %251 = vector.broadcast %250 : vector<32x1xf32> to vector<32x32xf32>
    %252 = arith.subf %248, %251 : vector<32x32xf32>
    %253 = math.exp %252 : vector<32x32xf32>
    %cst_92 = arith.constant dense<0.000000e+00> : vector<32xf32>
    %254 = vector.multi_reduction <add>, %253, %cst_92 [1] : vector<32x32xf32> to vector<32xf32>
    %255 = vector.shape_cast %254 : vector<32xf32> to vector<32x1xf32>
    %256 = tpu.reciprocal %255 {approx = true} : vector<32x1xf32> -> vector<32x1xf32>
    %257 = vector.broadcast %256 : vector<32x1xf32> to vector<32x32xf32>
    %258 = arith.mulf %253, %257 : vector<32x32xf32>
    %259 = vector.extract_strided_slice %223 {offsets = [0, 16], sizes = [32, 16], strides = [1, 1]} : vector<32x32xf32> to vector<32x16xf32>
    %cst_93 = arith.constant dense<0.000000e+00> : vector<32x16xf32>
    %260 = tpu.matmul %258, %259, %cst_93 {dimension_numbers = #tpu.dot_dimension_numbers<[1], [0], [0], [1], [0, 0, 1, 1], [], []>} : vector<32x32xf32>, vector<32x16xf32>, vector<32x16xf32> -> vector<32x16xf32>
    %261 = vector.extract_strided_slice %224 {offsets = [16, 0], sizes = [16, 32], strides = [1, 1]} : vector<32x32xf32> to vector<16x32xf32>
    %cst_94 = arith.constant dense<0.000000e+00> : vector<32x32xf32>
    %262 = tpu.matmul %260, %261, %cst_94 {dimension_numbers = #tpu.dot_dimension_numbers<[1], [0], [0], [1], [0, 0, 1, 1], [], []>} : vector<32x16xf32>, vector<16x32xf32>, vector<32x32xf32> -> vector<32x32xf32>
    %263 = arith.addf %244, %262 : vector<32x32xf32>
    %264 = vector.extract_strided_slice %211 {offsets = [0, 96], sizes = [1, 32], strides = [1, 1]} : vector<1x128xf32> to vector<1x32xf32>
    %265 = vector.broadcast %264 : vector<1x32xf32> to vector<32x32xf32>
    %266 = arith.addf %263, %265 : vector<32x32xf32>
    %267 = arith.addf %208, %266 : vector<32x32xf32>
    %cst_95 = arith.constant dense<0.000000e+00> : vector<32xf32>
    %268 = vector.multi_reduction <add>, %267, %cst_95 [1] : vector<32x32xf32> to vector<32xf32>
    %269 = vector.shape_cast %268 : vector<32xf32> to vector<32x1xf32>
    %cst_96 = arith.constant 3.200000e+01 : f32
    %270 = vector.broadcast %cst_96 : f32 to vector<32x1xf32>
    %271 = arith.divf %269, %270 : vector<32x1xf32>
    %272 = arith.mulf %267, %267 : vector<32x32xf32>
    %cst_97 = arith.constant dense<0.000000e+00> : vector<32xf32>
    %273 = vector.multi_reduction <add>, %272, %cst_97 [1] : vector<32x32xf32> to vector<32xf32>
    %274 = vector.shape_cast %273 : vector<32xf32> to vector<32x1xf32>
    %cst_98 = arith.constant 3.200000e+01 : f32
    %275 = vector.broadcast %cst_98 : f32 to vector<32x1xf32>
    %276 = arith.divf %274, %275 : vector<32x1xf32>
    %277 = arith.mulf %271, %271 : vector<32x1xf32>
    %278 = arith.subf %276, %277 : vector<32x1xf32>
    %cst_99 = arith.constant 0.000000e+00 : f32
    %279 = vector.broadcast %cst_99 : f32 to vector<32x1xf32>
    %280 = arith.maximumf %278, %279 : vector<32x1xf32>
    %281 = vector.broadcast %271 : vector<32x1xf32> to vector<32x32xf32>
    %282 = arith.subf %267, %281 : vector<32x32xf32>
    %cst_100 = arith.constant 9.99999996E-13 : f32
    %283 = vector.broadcast %cst_100 : f32 to vector<32x1xf32>
    %284 = arith.addf %280, %283 : vector<32x1xf32>
    %285 = math.rsqrt %284 : vector<32x1xf32>
    %286 = vector.broadcast %285 : vector<32x1xf32> to vector<32x32xf32>
    %287 = arith.mulf %282, %286 : vector<32x32xf32>
    %288 = vector.broadcast %213 : vector<1x32xf32> to vector<32x32xf32>
    %289 = arith.mulf %287, %288 : vector<32x32xf32>
    %290 = vector.broadcast %214 : vector<1x32xf32> to vector<32x32xf32>
    %291 = arith.addf %289, %290 : vector<32x32xf32>
    %292 = vector.extract_strided_slice %210 {offsets = [0, 0], sizes = [32, 64], strides = [1, 1]} : vector<32x128xf32> to vector<32x64xf32>
    %cst_101 = arith.constant dense<0.000000e+00> : vector<32x64xf32>
    %293 = tpu.matmul %291, %292, %cst_101 {dimension_numbers = #tpu.dot_dimension_numbers<[1], [0], [0], [1], [0, 0, 1, 1], [], []>} : vector<32x32xf32>, vector<32x64xf32>, vector<32x64xf32> -> vector<32x64xf32>
    %294 = vector.broadcast %212 : vector<1x64xf32> to vector<32x64xf32>
    %295 = arith.addf %293, %294 : vector<32x64xf32>
    %cst_102 = arith.constant 5.000000e-01 : f32
    %296 = vector.broadcast %cst_102 : f32 to vector<32x64xf32>
    %297 = arith.mulf %296, %295 : vector<32x64xf32>
    %cst_103 = arith.constant 0.707106769 : f32
    %298 = vector.broadcast %cst_103 : f32 to vector<32x64xf32>
    %299 = arith.mulf %295, %298 : vector<32x64xf32>
    %cst_104 = arith.constant 0.000000e+00 : f32
    %300 = vector.broadcast %cst_104 : f32 to vector<32x64xf32>
    %301 = arith.cmpf oge, %299, %300 : vector<32x64xf32>
    %cst_105 = arith.constant 1.000000e+00 : f32
    %cst_106 = arith.constant -1.000000e+00 : f32
    %302 = vector.broadcast %cst_105 : f32 to vector<32x64xf32>
    %303 = vector.broadcast %cst_106 : f32 to vector<32x64xf32>
    %304 = arith.select %301, %302, %303 : vector<32x64xi1>, vector<32x64xf32>
    %305 = math.absf %299 : vector<32x64xf32>
    %cst_107 = arith.constant 0.327591091 : f32
    %306 = vector.broadcast %cst_107 : f32 to vector<32x64xf32>
    %307 = arith.mulf %306, %305 : vector<32x64xf32>
    %cst_108 = arith.constant 1.000000e+00 : f32
    %308 = vector.broadcast %cst_108 : f32 to vector<32x64xf32>
    %309 = arith.addf %308, %307 : vector<32x64xf32>
    %310 = tpu.reciprocal %309 {approx = true} : vector<32x64xf32> -> vector<32x64xf32>
    %cst_109 = arith.constant 1.06140542 : f32
    %311 = vector.broadcast %cst_109 : f32 to vector<32x64xf32>
    %312 = arith.mulf %311, %310 : vector<32x64xf32>
    %cst_110 = arith.constant -1.45315206 : f32
    %313 = vector.broadcast %cst_110 : f32 to vector<32x64xf32>
    %314 = arith.addf %312, %313 : vector<32x64xf32>
    %315 = arith.mulf %314, %310 : vector<32x64xf32>
    %cst_111 = arith.constant 1.42141378 : f32
    %316 = vector.broadcast %cst_111 : f32 to vector<32x64xf32>
    %317 = arith.addf %315, %316 : vector<32x64xf32>
    %318 = arith.mulf %317, %310 : vector<32x64xf32>
    %cst_112 = arith.constant -0.284496725 : f32
    %319 = vector.broadcast %cst_112 : f32 to vector<32x64xf32>
    %320 = arith.addf %318, %319 : vector<32x64xf32>
    %321 = arith.mulf %320, %310 : vector<32x64xf32>
    %cst_113 = arith.constant 0.254829586 : f32
    %322 = vector.broadcast %cst_113 : f32 to vector<32x64xf32>
    %323 = arith.addf %321, %322 : vector<32x64xf32>
    %324 = arith.mulf %323, %310 : vector<32x64xf32>
    %cst_114 = arith.constant 0.000000e+00 : f32
    %325 = vector.broadcast %cst_114 : f32 to vector<32x64xf32>
    %326 = arith.subf %325, %305 : vector<32x64xf32>
    %327 = arith.mulf %326, %305 : vector<32x64xf32>
    %328 = math.exp %327 : vector<32x64xf32>
    %329 = arith.mulf %324, %328 : vector<32x64xf32>
    %cst_115 = arith.constant 1.000000e+00 : f32
    %330 = vector.broadcast %cst_115 : f32 to vector<32x64xf32>
    %331 = arith.subf %330, %329 : vector<32x64xf32>
    %332 = arith.mulf %304, %331 : vector<32x64xf32>
    %cst_116 = arith.constant 1.000000e+00 : f32
    %333 = vector.broadcast %cst_116 : f32 to vector<32x64xf32>
    %334 = arith.addf %333, %332 : vector<32x64xf32>
    %335 = arith.mulf %297, %334 : vector<32x64xf32>
    %336 = vector.extract_strided_slice %210 {offsets = [0, 64], sizes = [32, 64], strides = [1, 1]} : vector<32x128xf32> to vector<32x64xf32>
    %cst_117 = arith.constant dense<0.000000e+00> : vector<32x32xf32>
    %337 = tpu.matmul %335, %336, %cst_117 {dimension_numbers = #tpu.dot_dimension_numbers<[1], [1], [0], [0], [0, 0, 1, 0], [], []>} : vector<32x64xf32>, vector<32x64xf32>, vector<32x32xf32> -> vector<32x32xf32>
    %338 = vector.broadcast %217 : vector<1x32xf32> to vector<32x32xf32>
    %339 = arith.addf %337, %338 : vector<32x32xf32>
    %340 = arith.addf %291, %339 : vector<32x32xf32>
    %cst_118 = arith.constant dense<0.000000e+00> : vector<32xf32>
    %341 = vector.multi_reduction <add>, %340, %cst_118 [1] : vector<32x32xf32> to vector<32xf32>
    %342 = vector.shape_cast %341 : vector<32xf32> to vector<32x1xf32>
    %cst_119 = arith.constant 3.200000e+01 : f32
    %343 = vector.broadcast %cst_119 : f32 to vector<32x1xf32>
    %344 = arith.divf %342, %343 : vector<32x1xf32>
    %345 = arith.mulf %340, %340 : vector<32x32xf32>
    %cst_120 = arith.constant dense<0.000000e+00> : vector<32xf32>
    %346 = vector.multi_reduction <add>, %345, %cst_120 [1] : vector<32x32xf32> to vector<32xf32>
    %347 = vector.shape_cast %346 : vector<32xf32> to vector<32x1xf32>
    %cst_121 = arith.constant 3.200000e+01 : f32
    %348 = vector.broadcast %cst_121 : f32 to vector<32x1xf32>
    %349 = arith.divf %347, %348 : vector<32x1xf32>
    %350 = arith.mulf %344, %344 : vector<32x1xf32>
    %351 = arith.subf %349, %350 : vector<32x1xf32>
    %cst_122 = arith.constant 0.000000e+00 : f32
    %352 = vector.broadcast %cst_122 : f32 to vector<32x1xf32>
    %353 = arith.maximumf %351, %352 : vector<32x1xf32>
    %354 = vector.broadcast %344 : vector<32x1xf32> to vector<32x32xf32>
    %355 = arith.subf %340, %354 : vector<32x32xf32>
    %cst_123 = arith.constant 9.99999996E-13 : f32
    %356 = vector.broadcast %cst_123 : f32 to vector<32x1xf32>
    %357 = arith.addf %353, %356 : vector<32x1xf32>
    %358 = math.rsqrt %357 : vector<32x1xf32>
    %359 = vector.broadcast %358 : vector<32x1xf32> to vector<32x32xf32>
    %360 = arith.mulf %355, %359 : vector<32x32xf32>
    %361 = vector.broadcast %215 : vector<1x32xf32> to vector<32x32xf32>
    %362 = arith.mulf %360, %361 : vector<32x32xf32>
    %363 = vector.broadcast %216 : vector<1x32xf32> to vector<32x32xf32>
    %364 = arith.addf %362, %363 : vector<32x32xf32>
    %c128_124 = arith.constant 128 : index
    %c0_125 = arith.constant 0 : index
    %365 = vector.load %arg2[%c128_124, %c0_125] : memref<168x128xf32, #tpu.memory_space<vmem>>, vector<32x128xf32>
    %c164_126 = arith.constant 164 : index
    %c0_127 = arith.constant 0 : index
    %366 = vector.load %arg2[%c164_126, %c0_127] : memref<168x128xf32, #tpu.memory_space<vmem>>, vector<1x128xf32>
    %cst_128 = arith.constant dense<0.000000e+00> : vector<32x128xf32>
    %367 = tpu.matmul %364, %365, %cst_128 {dimension_numbers = #tpu.dot_dimension_numbers<[1], [0], [0], [1], [0, 0, 1, 1], [], []>} : vector<32x32xf32>, vector<32x128xf32>, vector<32x128xf32> -> vector<32x128xf32>
    %368 = vector.broadcast %366 : vector<1x128xf32> to vector<32x128xf32>
    %369 = arith.addf %367, %368 : vector<32x128xf32>
    %c0_129 = arith.constant 0 : index
    %c0_130 = arith.constant 0 : index
    %370 = vector.load %arg4[%c0_129, %c0_130] : memref<32x128xf32, #tpu.memory_space<vmem>>, vector<32x128xf32>
    tpu.vector_store %arg4[%c0_129, %c0_130], %369 {strides = array<i32>} : memref<32x128xf32, #tpu.memory_space<vmem>>, vector<32x128xf32>,
    return
  }
}

</mosaic_0001>

<bundles_post_ra>
// kernel: cross_attention_reranker.1
= control target key start
LH: loop header
LB: loop body
LE: loop exit
PB: predicated region body
PF: predicated region fallthrough
CT: control target
= control target key end

     0   :  { %v4157_v0 = vmov 0   ;;  %v21_v29 = vlaneseq  ;;  %v4158_v33 = vmov 1.0   ;;  %vm154_vm4 = vcmask 261120   ;;  %s4159_s23 = smov 96   ;;  %s4160_s24 = smov 80   ;;  %s5058_s0 = inlined_call_operand.vmem [shape: s32[32,1], index: 0, kind: input, shape index: {}]   ;;  %s5059_s3 = inlined_call_operand.vmem [shape: f32[176,32], index: 3, kind: input, shape index: {}]   ;;  %s5060_s2 = inlined_call_operand.vmem [shape: f32[168,128], index: 2, kind: input, shape index: {}]   ;;  %s5061_s1 = inlined_call_operand.vmem [shape: f32[1,32], index: 1, kind: input, shape index: {}]   ;;  %s5062_s4 = inlined_call_operand.vmem [shape: f32[32,128], index: 4, kind: output, shape index: {}]  }
   0x1   :  { %3899 = vset.pattern.permute.xlu0 %v4157_v0  ;;  %v17_v1 = vld [vmem:[%s5058_s0] sm:$0xff]  ;;  %3900 = vset.pattern.permute.xlu1 %v4157_v0  ;;  %v19_v2 = vld [vmem:[%s5058_s0 + $0x10] sm:$0xff]  ;;  %v18_v3 = vld [vmem:[%s5058_s0 + $0x8] sm:$0xff]  ;;  %vm395_vm5 = vcmask 130048   ;;  %s4161_s25 = smov 112   ;;  %s4164_s28 = smov 48  }
   0x2   :  { %24 = vperm.xlu0 %3899, %v17_v1   ;;  %30 = vperm.xlu1 %3900, %v19_v2   ;;  %v47_v4 = vld [vmem:[%s5059_s3] sm:$0xff]  ;;  %v48_v5 = vld [vmem:[%s5059_s3 + $0x8] sm:$0xff]  ;;  %v20_v6 = vld [vmem:[%s5058_s0 + $0x18] sm:$0xff]  ;;  %v4253_v30 = vand.u32 127, %v21_v29  ;;  %s4165_s29 = smov 32   ;;  %vm1443_vm11 = vcmask 523264  }
   0x3   :  { %v3689_v7 = vpack.c.bf16 %v48_v5, %v47_v4  ;;  %v49_v8 = vld [vmem:[%s5059_s3 + $0x10] sm:$0xff]  ;;  %v50_v9 = vld [vmem:[%s5059_s3 + $0x18] sm:$0xff]  ;;  %v51_v11 = vld [vmem:[%s5059_s3 + $0x20] sm:$0xff] }
   0x4   :  { %v3693_v10 = vpack.c.bf16 %v50_v9, %v49_v8  ;;  %v52_v12 = vld [vmem:[%s5059_s3 + $0x28] sm:$0xff]  ;;  %v53_v14 = vld [vmem:[%s5059_s3 + $0x30] sm:$0xff]  ;;  %v54_v15 = vld [vmem:[%s5059_s3 + $0x38] sm:$0xff] }
   0x5   :  { %3690 = vmatprep.subr.bf16.mxu0 %v3689_v7  ;;  %v3697_v13 = vpack.c.bf16 %v52_v12, %v51_v11  ;;  %v3701_v16 = vpack.c.bf16 %v54_v15, %v53_v14  ;;  %v55_v17 = vld [vmem:[%s5059_s3 + $0x40] sm:$0xff]  ;;  %v56_v18 = vld [vmem:[%s5059_s3 + $0x48] sm:$0xff]  ;;  %v57_v20 = vld [vmem:[%s5059_s3 + $0x50] sm:$0xff] }
   0x6   :  { %27 = vperm.xlu0 %3899, %v18_v3   ;;  %33 = vperm.xlu1 %3900, %v20_v6   ;;  %v3705_v19 = vpack.c.bf16 %v56_v18, %v55_v17  ;;  %v58_v21 = vld [vmem:[%s5059_s3 + $0x58] sm:$0xff]  ;;  %v59_v23 = vld [vmem:[%s5059_s3 + $0x60] sm:$0xff]  ;;  %v60_v24 = vld [vmem:[%s5059_s3 + $0x68] sm:$0xff] }
   0x7   :  { %3692 = vmatpush3.bf16.msra.mxu0 %v3689_v7  ;;  %v3709_v22 = vpack.c.bf16 %v58_v21, %v57_v20  ;;  %v3713_v25 = vpack.c.bf16 %v60_v24, %v59_v23  ;;  %v61_v26 = vld [vmem:[%s5059_s3 + $0x70] sm:$0xff]  ;;  %v62_v27 = vld [vmem:[%s5059_s3 + $0x78] sm:$0xff]  ;;  %v64_v36 = vld [vmem:[%s5059_s3 + $0x88] sm:$0xff] }
   0x8   :  { %3694 = vmatprep.subr.bf16.mxu0 %v3693_v10  ;;  %v3717_v28 = vpack.c.bf16 %v62_v27, %v61_v26  ;;  %v63_v37 = vld [vmem:[%s5059_s3 + $0x80] sm:$0xff]  ;;  %v65_v43 = vld [vmem:[%s5059_s3 + $0x90] sm:$0xff]  ;;  %v66_v53 = vld [vmem:[%s5059_s3 + $0x98] sm:$0xff] }
   0x9   :  { %v4302_v60 = vld [vmem:[%s5060_s2] sm:$0xff]  ;;  %v4307_v61 = vld [vmem:[%s5060_s2 + $0x8] sm:$0xff]  ;;  %v4316_v0 = vld [vmem:[%s5060_s2 + $0x10] sm:$0xff] }
   0xa   :  { %v3946_v62 = vpack.i.bf16 %v4307_v61, %v4302_v60  ;;  %v3721_v63 = vpack.c.bf16 %v4307_v61, %v4302_v60  ;;  %v4321_v1 = vld [vmem:[%s5060_s2 + $0x18] sm:$0xff]  ;;  %vm4379_vm6 = vmpackc.low %vm395_vm5, %vm395_vm5 }
   0xb   :  { %3696 = vmatpush3.bf16.msra.mxu0 %v3693_v10  ;;  %v3725_v2 = vpack.c.bf16 %v4321_v1, %v4316_v0  ;;  %vm4582_vm12 = vmpackc.low %vm1443_vm11, %vm1443_vm11 }
   0xc   :  { %3698 = vmatprep.subr.bf16.mxu0 %v3697_v13  ;;  %3722 = vmatprep.subr.bf16.mxu1 %v3721_v63 }
   0xd   :  { %3724 = vmatpush3.bf16.msra.mxu1 %v3721_v63  ;;  %v4354_v63 = vld [vmem:[%s5060_s2 + $0xa0] ss:$0 sm:$0xff] }
   0xe   :  { %3726 = vmatprep.subr.bf16.mxu1 %v3725_v2 }
   0xf   :  { %3700 = vmatpush3.bf16.msra.mxu0 %v3697_v13 }
  0x10   :  { %3702 = vmatprep.subr.bf16.mxu0 %v3701_v16 }
  0x11   :  { %3728 = vmatpush3.bf16.msra.mxu1 %v3725_v2 }
  0x13   :  { %3704 = vmatpush3.bf16.msra.mxu0 %v3701_v16 }
  0x14   :  { %3706 = vmatprep.subr.bf16.mxu0 %v3705_v19 }
  0x17   :  { %3708 = vmatpush3.bf16.msra.mxu0 %v3705_v19 }
  0x18   :  { %3710 = vmatprep.subr.bf16.mxu0 %v3709_v22 }
  0x1b   :  { %3712 = vmatpush3.bf16.msra.mxu0 %v3709_v22 }
  0x1c   :  { %3714 = vmatprep.subr.bf16.mxu0 %v3713_v25 }
  0x1f   :  { %3716 = vmatpush3.bf16.msra.mxu0 %v3713_v25 }
  0x20   :  { %3718 = vmatprep.subr.bf16.mxu0 %v3717_v28 }
  0x23   :  { %3720 = vmatpush3.bf16.msra.mxu0 %v3717_v28 }
  0x81   :  { %v25_v31 = vpop.permute.xlu0 %24  ;;  %v31_v32 = vpop.permute.xlu1 %30 }
  0x82   :  { %vm35_vm0 = vcmp.eq.s32.totalorder %v4253_v30, %v25_v31  ;;  %vm37_vm1 = vcmp.eq.s32.totalorder %v4253_v30, %v31_v32 }
  0x83   :  { %3433 = vmatprep.mubr.msk.f32.mxu0 %vm35_vm0, %v4158_v33 }
  0x85   :  { %v28_v34 = vpop.permute.xlu0 %27  ;;  %v34_v35 = vpop.permute.xlu1 %33 }
  0x86   :  { %vm36_vm2 = vcmp.eq.s32.totalorder %v4253_v30, %v28_v34  ;;  %vm38_vm3 = vcmp.eq.s32.totalorder %v4253_v30, %v34_v35 }
  0x87   :  { %3434 = vmatmul.mubr.msk.f32.vlgmr.msra.gmra.mrb[0].mxu0 %vm36_vm2, %v4158_v33 }
  0x88   :  { %3436 = vmatprep.mubr.msk.f32.mxu0 %vm37_vm1, %v4158_v33 }
  0x8b   :  { %3437 = vmatmul.mubr.msk.f32.gmra.mrb[2].mxu0 %vm38_vm3, %v4158_v33 }
 0x15a   :  { %v3435_v38 = vpop.f32.mrb[0].mxu0 }
 0x15b   :  { %v4265_v39 = vadd.f32 %v3435_v38, %v64_v36  ;;  %v133_v40 = vpop.f32.mrb[1].mxu0 }
 0x15c   :  { %v4267_v41 = vadd.f32 %v133_v40, %v63_v37  ;;  %v3119_v40 = vld [vmem:[%s5059_s3 + $0xa0] ss:$0 sm:$0xff] }
 0x15d   :  { %v158_v42 = vsel %vm154_vm4, %v4265_v39, 0.0  ;;  %v173_v52 = vmul.f32 %v4265_v39, %v4265_v39 }
 0x15e   :  { %159 = vadd.xlane.f32.xlu1 %v158_v42  ;;  %v3438_v44 = vpop.f32.mrb[2].mxu0  ;;  %v155_v45 = vsel %vm154_vm4, %v4267_v41, 0.0  ;;  %v172_v46 = vmul.f32 %v4267_v41, %v4267_v41 }
 0x15f   :  { %v143_v47 = vpop.f32.mrb[3].mxu0  ;;  %156 = vadd.xlane.f32.xlu0 %v155_v45  ;;  %v4291_v55 = vadd.f32 %v3438_v44, %v66_v53  ;;  %v179_v56 = vsel %vm154_vm4, %v173_v52, 0.0 }
 0x160   :  { %v4278_v48 = vadd.f32 %v143_v47, %v65_v43  ;;  %v176_v50 = vsel %vm154_vm4, %v172_v46, 0.0  ;;  %v3120_v43 = vld [vmem:[%s5059_s3 + $0xa1] ss:$0 sm:$0xff] }
 0x161   :  { %v164_v57 = vsel %vm154_vm4, %v4291_v55, 0.0  ;;  %v175_v58 = vmul.f32 %v4291_v55, %v4291_v55 }
 0x162   :  { %v161_v49 = vsel %vm154_vm4, %v4278_v48, 0.0  ;;  %v174_v51 = vmul.f32 %v4278_v48, %v4278_v48 }
 0x163   :  { %162 = vadd.xlane.f32.xlu1 %v161_v49  ;;  %177 = vadd.xlane.f32.xlu0 %v176_v50  ;;  %v185_v59 = vsel %vm154_vm4, %v175_v58, 0.0 }
 0x164   :  { %v182_v54 = vsel %vm154_vm4, %v174_v51, 0.0 }
 0x167   :  { %183 = vadd.xlane.f32.xlu1 %v182_v54  ;;  %180 = vadd.xlane.f32.xlu0 %v179_v56 }
 0x16b   :  { %165 = vadd.xlane.f32.xlu0 %v164_v57 }
 0x16f   :  { %186 = vadd.xlane.f32.xlu0 %v185_v59 }
 0x1eb   :  { %v160_v3 = vpop.xlane.xlu1 %159 }
 0x1ec   :  { %v157_v4 = vpop.xlane.xlu0 %156  ;;  %v169_v8 = vmul.f32 0.03125, %v160_v3 }
 0x1ed   :  { %v168_v5 = vmul.f32 0.03125, %v157_v4 }
 0x1ee   :  { %v193_v16 = vmul.f32 %v169_v8, %v169_v8  ;;  %v205_v47 = vsub.f32 %v4265_v39, %v169_v8 }
 0x1ef   :  { %v192_v9 = vmul.f32 %v168_v5, %v168_v5  ;;  %v204_v36 = vsub.f32 %v4267_v41, %v168_v5 }
 0x1f0   :  { %v163_v6 = vpop.xlane.xlu1 %162  ;;  %v178_v7 = vpop.xlane.xlu0 %177 }
 0x1f1   :  { %v170_v10 = vmul.f32 0.03125, %v163_v6  ;;  %v188_v11 = vmul.f32 0.03125, %v178_v7 }
 0x1f3   :  { %v194_v12 = vmul.f32 %v170_v10, %v170_v10  ;;  %v196_v13 = vsub.f32 %v188_v11, %v192_v9  ;;  %v206_v44 = vsub.f32 %v4278_v48, %v170_v10 }
 0x1f4   :  { %v184_v14 = vpop.xlane.xlu1 %183  ;;  %v181_v15 = vpop.xlane.xlu0 %180 }
 0x1f5   :  { %v200_v17 = vmax.f32 %v196_v13, 0.0  ;;  %v190_v18 = vmul.f32 0.03125, %v184_v14  ;;  %v189_v19 = vmul.f32 0.03125, %v181_v15 }
 0x1f7   :  { %v208_v20 = vadd.f32 1e-12, %v200_v17  ;;  %v198_v21 = vsub.f32 %v190_v18, %v194_v12  ;;  %v197_v22 = vsub.f32 %v189_v19, %v193_v16 }
 0x1f8   :  { %v166_v23 = vpop.xlane.xlu0 %165 }
 0x1f9   :  { %4021 = vrsqrt.f32 %v208_v20  ;;  %v202_v24 = vmax.f32 %v198_v21, 0.0  ;;  %v201_v25 = vmax.f32 %v197_v22, 0.0  ;;  %v171_v26 = vmul.f32 0.03125, %v166_v23 }
 0x1fb   :  { %v210_v27 = vadd.f32 1e-12, %v202_v24  ;;  %v209_v28 = vadd.f32 1e-12, %v201_v25  ;;  %v195_v32 = vmul.f32 %v171_v26, %v171_v26  ;;  %v207_v48 = vsub.f32 %v4291_v55, %v171_v26 }
 0x1fc   :  { %v187_v31 = vpop.xlane.xlu0 %186 }
 0x1fd   :  { %4023 = vrsqrt.f32 %v210_v27  ;;  %v191_v33 = vmul.f32 0.03125, %v187_v31 }
 0x1fe   :  { %4025 = vrsqrt.f32 %v209_v28 }
 0x1ff   :  { %v199_v34 = vsub.f32 %v191_v33, %v195_v32 }
 0x201   :  { %v203_v35 = vmax.f32 %v199_v34, 0.0  ;;  %v237_v34 = vshrl.u32 %v21_v29, 7 }
 0x203   :  { %v4022_v37 = vpop.eup %4021  ;;  %v211_v38 = vadd.f32 1e-12, %v203_v35  ;;  %v254_v35 = vld [vmem:[%s5061_s1] sm:$0x1]  ;;  %s4163_s1 = smov 64  }
 0x204   :  { %v216_v42 = vmul.f32 %v4022_v37, %v204_v36  ;;  %v238_v36 = vadd.s32 8, %v237_v34  ;;  %v3121_v37 = vadd.f32 -1.0, %v254_v35 }
 0x205   :  { %4027 = vrsqrt.f32 %v211_v38 }
 0x206   :  { %v224_v45 = vmul.f32 %v3119_v40, %v216_v42  ;;  %v242_v38 = vshra.s32 %v238_v36, 4  ;;  %v241_v42 = vshra.s32 %v237_v34, 4 }
 0x207   :  { %v4024_v46 = vpop.eup %4023 }
 0x208   :  { %v4026_v49 = vpop.eup %4025  ;;  %v4334_v41 = vadd.f32 %v3120_v43, %v224_v45  ;;  %v218_v50 = vmul.f32 %v4024_v46, %v206_v44  ;;  %v256_v44 = vmul.f32 10000.0, %v3121_v37  ;;  %v260_v45 = vsub.s32 0, %v237_v34 }
 0x209   :  { %v217_v51 = vmul.f32 %v4026_v49, %v205_v47  ;;  %v240_v46 = vadd.s32 24, %v237_v34 }
 0x20a   :  { %3447 = vmatprep.mubr.msk.f32.mxu1 %vm154_vm4, %v4334_v41  ;;  %v226_v52 = vmul.f32 %v3119_v40, %v218_v50  ;;  %v261_v49 = vrot.slane %v256_v44, %v260_v45  ;;  %v4162_v50 = vmov -10000.0  }
 0x20b   :  { %v225_v53 = vmul.f32 %v3119_v40, %v217_v51  ;;  %v244_v51 = vshra.s32 %v240_v46, 4 }
 0x20c   :  { %v4338_v54 = vadd.f32 %v3120_v43, %v226_v52 }
 0x20d   :  { %v4340_v56 = vadd.f32 %v3120_v43, %v225_v53 }
 0x20f   :  { %v4028_v57 = vpop.eup %4027  ;;  %3448 = vmatmul.mubr.msk.f32.vlgmr.msra.gmra.mrb[0].mxu1 %vm154_vm4, %v4340_v56 }
 0x210   :  { %3450 = vmatprep.mubr.msk.f32.mxu1 %vm154_vm4, %v4338_v54  ;;  %v219_v39 = vmul.f32 %v4028_v57, %v207_v48 }
 0x212   :  { %v227_v58 = vmul.f32 %v3119_v40, %v219_v39  ;;  %v245_v40 = vshra.s32 %v4253_v30, 4 }
 0x214   :  { %v4347_v59 = vadd.f32 %v3120_v43, %v227_v58  ;;  %v239_v43 = vadd.s32 16, %v237_v34  ;;  %vm247_vm7 = vcmp.eq.s32.totalorder %v242_v38, %v245_v40  ;;  %vm246_vm8 = vcmp.eq.s32.totalorder %v241_v42, %v245_v40 }
 0x215   :  { %v251_v29 = vsel %vm247_vm7, 0.0, %v4162_v50  ;;  %v250_v52 = vsel %vm246_vm8, 0.0, %v4162_v50  ;;  %vm249_vm10 = vcmp.eq.s32.totalorder %v244_v51, %v245_v40 }
 0x216   :  { %3451 = vmatmul.mubr.msk.f32.gmra.mrb[2].mxu1 %vm154_vm4, %v4347_v59  ;;  %v243_v47 = vshra.s32 %v239_v43, 4  ;;  %v4411_v53 = vadd.f32 %v261_v49, %v251_v29  ;;  %v4413_v48 = vadd.f32 %v261_v49, %v250_v52 }
 0x218   :  { %vm248_vm9 = vcmp.eq.s32.totalorder %v243_v47, %v245_v40 }
 0x219   :  { %v252_v30 = vsel %vm248_vm9, 0.0, %v4162_v50 }
 0x2e2   :  { %v3449_v55 = vpop.f32.mrb[0].mxu1 }
 0x2e3   :  { %v370_v2 = vadd.f32 %v3449_v55, %v4354_v63  ;;  %v364_v3 = vpop.f32.mrb[1].mxu1  ;;  %v253_v55 = vsel %vm249_vm10, 0.0, %v4162_v50 }
 0x2e4   :  { %v365_v4 = vadd.f32 %v4354_v63, %v364_v3  ;;  %v4417_v3 = vadd.f32 %v261_v49, %v252_v30 }
 0x2e6   :  { %3461 = vmatprep.mubr.msk.f32.mxu1 %vm395_vm5, %v365_v4  ;;  %v4359_v5 = vpack.i.bf16 %v370_v2, %v365_v4 }
 0x2e8   :  { %3902 = vrot.lane.b32.xlu1 %v4359_v5, %s4159_s23 }
 0x2e9   :  { %v3452_v6 = vpop.f32.mrb[2].mxu1 }
 0x2ea   :  { %v380_v7 = vadd.f32 %v3452_v6, %v4354_v63  ;;  %v374_v8 = vpop.f32.mrb[3].mxu1 }
 0x2eb   :  { %v375_v9 = vadd.f32 %v4354_v63, %v374_v8 }
 0x2ec   :  { %3912 = vrot.lane.b32.xlu1 %v4359_v5, %s4160_s24 }
 0x2ed   :  { %v4367_v10 = vpack.i.bf16 %v380_v7, %v375_v9 }
 0x2ef   :  { %3907 = vrot.lane.b32.xlu0 %v4367_v10, %s4159_s23 }
 0x2f0   :  { %3917 = vrot.lane.b32.xlu1 %v4367_v10, %s4160_s24 }
 0x2f3   :  { %650 = vrot.lane.b32.xlu0 %v365_v4, %s4161_s25 }
 0x2f4   :  { %652 = vrot.lane.b32.xlu1 %v370_v2, %s4161_s25 }
 0x2f7   :  { %654 = vrot.lane.b32.xlu0 %v375_v9, %s4161_s25 }
 0x2f8   :  { %656 = vrot.lane.b32.xlu1 %v380_v7, %s4161_s25 }
 0x35a   :  { %v3903_v11 = vpop.permute.xlu1 %3902 }
 0x35b   :  { %v3905_v12 = vunpack.i.h.bf16 %v3903_v11  ;;  %v3904_v13 = vunpack.i.l.bf16 %v3903_v11 }
 0x35d   :  { %v3729_v15 = vpack.c.bf16 %v3905_v12, %v3904_v13 }
 0x35e   :  { %v3913_v16 = vpop.permute.xlu1 %3912 }
 0x35f   :  { %v3915_v17 = vunpack.i.h.bf16 %v3913_v16  ;;  %v3914_v18 = vunpack.i.l.bf16 %v3913_v16  ;;  %3731 = vmatprep.subr.msk.bf16.mxu1 %vm4379_vm6, %v3729_v15 }
 0x360   :  { %3734 = vmatpush3.bf16.xpose.msk.msra.mxu1 %vm4379_vm6, %v3729_v15 }
 0x361   :  { %v3749_v19 = vpack.c.bf16 %v3915_v17, %v3914_v18  ;;  %v3908_v20 = vpop.permute.xlu0 %3907 }
 0x362   :  { %v3918_v21 = vpop.permute.xlu1 %3917  ;;  %v3910_v22 = vunpack.i.h.bf16 %v3908_v20  ;;  %v3909_v23 = vunpack.i.l.bf16 %v3908_v20 }
 0x363   :  { %v3920_v24 = vunpack.i.h.bf16 %v3918_v21  ;;  %v3919_v25 = vunpack.i.l.bf16 %v3918_v21  ;;  %3751 = vmatprep.subr.msk.bf16.mxu0 %vm4379_vm6, %v3749_v19 }
 0x364   :  { %v3735_v26 = vpack.c.bf16 %v3910_v22, %v3909_v23  ;;  %3754 = vmatpush3.bf16.xpose.msk.msra.mxu0 %vm4379_vm6, %v3749_v19 }
 0x365   :  { %v3755_v27 = vpack.c.bf16 %v3920_v24, %v3919_v25  ;;  %v651_v28 = vpop.permute.xlu0 %650 }
 0x366   :  { %3737 = vmatprep.subr.msk.bf16.mxu1 %vm4379_vm6, %v3735_v26  ;;  %3489 = vmatprep.mubr.msk.f32.mxu0 %vm395_vm5, %v651_v28  ;;  %v653_v31 = vpop.permute.xlu1 %652 }
 0x367   :  { %3757 = vmatprep.subr.msk.bf16.mxu0 %vm4379_vm6, %v3755_v27 }
 0x368   :  { %3740 = vmatpush3.bf16.xpose.msk.msra.mxu1 %vm4379_vm6, %v3735_v26 }
 0x369   :  { %v655_v32 = vpop.permute.xlu0 %654 }
 0x36a   :  { %v657_v33 = vpop.permute.xlu1 %656 }
 0x36c   :  { %3760 = vmatpush3.bf16.xpose.msk.msra.mxu0 %vm4379_vm6, %v3755_v27 }
 0x36f   :  { %3462 = vmatmul.mubr.msk.f32.vlgmr.msra.gmra.mrb[4].mxu1 %vm395_vm5, %v370_v2 }
 0x370   :  { %3464 = vmatprep.mubr.msk.f32.mxu1 %vm395_vm5, %v375_v9 }
 0x373   :  { %3465 = vmatmul.mubr.msk.f32.gmra.mrb[6].mxu1 %vm395_vm5, %v380_v7  ;;  %3490 = vmatmul.mubr.msk.f32.vlgmr.msra.gmra.mrb[4].mxu0 %vm395_vm5, %v653_v31  ;;  %v4420_v7 = vadd.f32 %v261_v49, %v253_v55 }
 0x374   :  { %3492 = vmatprep.mubr.msk.f32.mxu0 %vm395_vm5, %v655_v32 }
 0x377   :  { %3493 = vmatmul.mubr.msk.f32.gmra.mrb[6].mxu0 %vm395_vm5, %v657_v33 }
 0x442   :  { %v3463_v57 = vpop.f32.mrb[4].mxu1 }
 0x443   :  { %v484_v39 = vadd.f32 %v3463_v57, %v4411_v53  ;;  %v478_v58 = vpop.f32.mrb[5].mxu1 }
 0x444   :  { %v479_v2 = vadd.f32 %v478_v58, %v4413_v48 }
 0x445   :  { %v500_v4 = vsel %vm154_vm4, %v484_v39, -inf }
 0x446   :  { %v3491_v6 = vpop.f32.mrb[4].mxu0  ;;  %501 = vmax.xlane.f32.xlu1 %v500_v4  ;;  %v3466_v8 = vpop.f32.mrb[6].mxu1  ;;  %v497_v9 = vsel %vm154_vm4, %v479_v2, -inf }
 0x447   :  { %v488_v11 = vpop.f32.mrb[7].mxu1  ;;  %v748_v12 = vpop.f32.mrb[5].mxu0  ;;  %498 = vmax.xlane.f32.xlu0 %v497_v9  ;;  %v494_v16 = vadd.f32 %v3466_v8, %v4420_v7  ;;  %v754_v22 = vadd.f32 %v3491_v6, %v4411_v53 }
 0x448   :  { %v4424_v13 = vadd.f32 %v488_v11, %v4417_v3  ;;  %v749_v15 = vadd.f32 %v748_v12, %v4413_v48 }
 0x449   :  { %v506_v24 = vsel %vm154_vm4, %v494_v16, -inf  ;;  %v770_v26 = vsel %vm154_vm4, %v754_v22, -inf }
 0x44a   :  { %v3494_v17 = vpop.f32.mrb[6].mxu0  ;;  %v767_v18 = vsel %vm154_vm4, %v749_v15, -inf  ;;  %v503_v19 = vsel %vm154_vm4, %v4424_v13, -inf }
 0x44b   :  { %v758_v20 = vpop.f32.mrb[7].mxu0  ;;  %768 = vmax.xlane.f32.xlu1 %v767_v18  ;;  %504 = vmax.xlane.f32.xlu0 %v503_v19  ;;  %v764_v25 = vadd.f32 %v3494_v17, %v4420_v7 }
 0x44c   :  { %v4432_v21 = vadd.f32 %v758_v20, %v4417_v3 }
 0x44d   :  { %v776_v27 = vsel %vm154_vm4, %v764_v25, -inf }
 0x44e   :  { %v773_v23 = vsel %vm154_vm4, %v4432_v21, -inf }
 0x44f   :  { %774 = vmax.xlane.f32.xlu1 %v773_v23  ;;  %507 = vmax.xlane.f32.xlu0 %v506_v24 }
 0x453   :  { %771 = vmax.xlane.f32.xlu0 %v770_v26 }
 0x457   :  { %777 = vmax.xlane.f32.xlu0 %v776_v27 }
 0x460   :  { %3922 = vrot.lane.b32.xlu1 %v4359_v5, %s4163_s1 }
 0x4d3   :  { %v502_v28 = vpop.xlane.xlu1 %501 }
 0x4d4   :  { %v510_v31 = vsub.f32 %v484_v39, %v502_v28  ;;  %v499_v32 = vpop.xlane.xlu0 %498 }
 0x4d5   :  { %v509_v33 = vsub.f32 %v479_v2, %v499_v32 }
 0x4d6   :  { %v515_v34 = vmul.f32 1.442695, %v510_v31 }
 0x4d7   :  { %v513_v35 = vmul.f32 1.442695, %v509_v33 }
 0x4d8   :  { %4029 = vpow2.f32 %v515_v34  ;;  %v769_v36 = vpop.xlane.xlu1 %768  ;;  %v505_v37 = vpop.xlane.xlu0 %504 }
 0x4d9   :  { %4031 = vpow2.f32 %v513_v35  ;;  %v779_v38 = vsub.f32 %v749_v15, %v769_v36  ;;  %v511_v18 = vsub.f32 %v4424_v13, %v505_v37  ;;  %v3941_v13 = vpack.i.bf16 %v4321_v1, %v4316_v0 }
 0x4db   :  { %v783_v40 = vmul.f32 1.442695, %v779_v38  ;;  %v517_v19 = vmul.f32 1.442695, %v511_v18 }
 0x4dc   :  { %v775_v42 = vpop.xlane.xlu1 %774  ;;  %v508_v43 = vpop.xlane.xlu0 %507 }
 0x4dd   :  { %4033 = vpow2.f32 %v783_v40  ;;  %v512_v44 = vsub.f32 %v494_v16, %v508_v43  ;;  %v781_v20 = vsub.f32 %v4432_v21, %v775_v42 }
 0x4df   :  { %v519_v52 = vmul.f32 1.442695, %v512_v44 }
 0x4e0   :  { %v3923_v45 = vpop.permute.xlu1 %3922  ;;  %v772_v46 = vpop.xlane.xlu0 %771 }
 0x4e1   :  { %v3925_v47 = vunpack.i.h.bf16 %v3923_v45  ;;  %v3924_v49 = vunpack.i.l.bf16 %v3923_v45  ;;  %v780_v50 = vsub.f32 %v754_v22, %v772_v46  ;;  %v787_v22 = vmul.f32 1.442695, %v781_v20 }
 0x4e2   :  { %v4443_v29 = vpop.eup %4029 }
 0x4e3   :  { %v4032_v51 = vpop.eup %4031  ;;  %v3741_v30 = vpack.c.bf16 %v3925_v47, %v3924_v49  ;;  %v785_v57 = vmul.f32 1.442695, %v780_v50  ;;  %v524_v39 = vsel %vm154_vm4, %v4443_v29, 0.0 }
 0x4e4   :  { %525 = vadd.xlane.f32.xlu0 %v524_v39  ;;  %v778_v58 = vpop.xlane.xlu0 %777  ;;  %v521_v55 = vsel %vm154_vm4, %v4032_v51, 0.0 }
 0x4e5   :  { %4035 = vpow2.f32 %v785_v57  ;;  %v782_v2 = vsub.f32 %v764_v25, %v778_v58  ;;  %3742 = vmatprep.subr.bf16.mxu1 %v3741_v30  ;;  %522 = vadd.xlane.f32.xlu1 %v521_v55 }
 0x4e6   :  { %3744 = vmatpush3.bf16.msra.mxu1 %v3741_v30  ;;  %4037 = vpow2.f32 %v519_v52 }
 0x4e7   :  { %v4448_v4 = vpop.eup %4033  ;;  %v789_v6 = vmul.f32 1.442695, %v782_v2 }
 0x4e8   :  { %v791_v8 = vsel %vm154_vm4, %v4448_v4, 0.0 }
 0x4e9   :  { %792 = vadd.xlane.f32.xlu1 %v791_v8  ;;  %4039 = vpow2.f32 %v789_v6 }
 0x4ea   :  { %4041 = vpow2.f32 %v517_v19 }
 0x4eb   :  { %4043 = vpow2.f32 %v787_v22 }
 0x4ef   :  { %v4452_v9 = vpop.eup %4035 }
 0x4f0   :  { %v794_v11 = vsel %vm154_vm4, %v4452_v9, 0.0  ;;  %v4456_v12 = vpop.eup %4037 }
 0x4f1   :  { %795 = vadd.xlane.f32.xlu0 %v794_v11  ;;  %v530_v15 = vsel %vm154_vm4, %v4456_v12, 0.0 }
 0x4f3   :  { %v4460_v16 = vpop.eup %4039 }
 0x4f4   :  { %v800_v17 = vsel %vm154_vm4, %v4460_v16, 0.0  ;;  %v4042_v23 = vpop.eup %4041 }
 0x4f5   :  { %531 = vadd.xlane.f32.xlu0 %v530_v15  ;;  %v527_v24 = vsel %vm154_vm4, %v4042_v23, 0.0  ;;  %v4471_v25 = vpop.eup %4043 }
 0x4f9   :  { %801 = vadd.xlane.f32.xlu0 %v800_v17 }
 0x4fa   :  { %3932 = vrot.lane.b32.xlu1 %v4359_v5, %s4164_s28  ;;  %v797_v5 = vsel %vm154_vm4, %v4471_v25, 0.0 }
 0x50f   :  { %3927 = vrot.lane.b32.xlu0 %v4367_v10, %s4163_s1 }
 0x513   :  { %3942 = vrot.lane.b32.xlu0 %v3941_v13, %s4165_s29 }
 0x517   :  { %1131 = vrot.lane.b32.xlu0 %v4354_v63, %s4165_s29 }
 0x51e   :  { %528 = vadd.xlane.f32.xlu1 %v527_v24 }
 0x522   :  { %798 = vadd.xlane.f32.xlu1 %v797_v5 }
 0x533   :  { %3937 = vrot.lane.b32.xlu1 %v4367_v10, %s4164_s28 }
 0x537   :  { %3947 = vrot.lane.b32.xlu1 %v3946_v62, %s4165_s29 }
 0x571   :  { %v526_v26 = vpop.xlane.xlu0 %525 }
 0x572   :  { %v523_v21 = vpop.xlane.xlu1 %522 }
 0x573   :  { %4045 = vrcp.f32 %v523_v21 }
 0x574   :  { %4047 = vrcp.f32 %v526_v26 }
 0x576   :  { %v793_v0 = vpop.xlane.xlu1 %792 }
 0x577   :  { %4049 = vrcp.f32 %v793_v0 }
 0x57a   :  { %v3933_v32 = vpop.permute.xlu1 %3932 }
 0x57b   :  { %v3935_v61 = vunpack.i.h.bf16 %v3933_v32  ;;  %v3934_v62 = vunpack.i.l.bf16 %v3933_v32 }
 0x57d   :  { %v4046_v27 = vpop.eup %4045  ;;  %v3761_v36 = vpack.c.bf16 %v3935_v61, %v3934_v62 }
 0x57e   :  { %v796_v28 = vpop.xlane.xlu0 %795  ;;  %v537_v10 = vmul.f32 %v4046_v27, %v4032_v51  ;;  %v4048_v63 = vpop.eup %4047 }
 0x57f   :  { %v538_v37 = vmul.f32 %v4048_v63, %v4443_v29 }
 0x580   :  { %3475 = vmatprep.mubr.msk.f32.mxu1 %vm154_vm4, %v537_v10 }
 0x581   :  { %v4050_v43 = vpop.eup %4049 }
 0x582   :  { %v532_v1 = vpop.xlane.xlu0 %531  ;;  %v807_v52 = vmul.f32 %v4050_v43, %v4448_v4  ;;  %v273_v43 = vld [vmem:[%s5060_s2 + $0x30] sm:$0xff] }
 0x583   :  { %4051 = vrcp.f32 %v532_v1 }
 0x586   :  { %v802_v31 = vpop.xlane.xlu0 %801 }
 0x58a   :  { %v3928_v60 = vpop.permute.xlu0 %3927 }
 0x58b   :  { %v3930_v33 = vunpack.i.h.bf16 %v3928_v60  ;;  %v3929_v34 = vunpack.i.l.bf16 %v3928_v60 }
 0x58d   :  { %v3745_v35 = vpack.c.bf16 %v3930_v33, %v3929_v34  ;;  %v4052_v46 = vpop.eup %4051 }
 0x58e   :  { %v540_v29 = vmul.f32 %v4052_v46, %v4456_v12  ;;  %v3943_v2 = vpop.permute.xlu0 %3942 }
 0x58f   :  { %3746 = vmatprep.subr.bf16.mxu1 %v3745_v35  ;;  %v3945_v4 = vunpack.i.h.bf16 %v3943_v2  ;;  %v3944_v6 = vunpack.i.l.bf16 %v3943_v2 }
 0x590   :  { %3748 = vmatpush3.bf16.msra.mxu1 %v3745_v35 }
 0x591   :  { %3762 = vmatprep.subr.bf16.mxu1 %v3761_v36  ;;  %v3769_v8 = vpack.c.bf16 %v3945_v4, %v3944_v6 }
 0x593   :  { %3476 = vmatmul.mubr.msk.f32.vlgmr.msra.gmra.mrb[8].mxu1 %vm154_vm4, %v538_v37 }
 0x594   :  { %3764 = vmatpush3.bf16.msra.mxu1 %v3761_v36 }
 0x5ab   :  { %v529_v38 = vpop.xlane.xlu1 %528 }
 0x5ac   :  { %4053 = vrcp.f32 %v529_v38  ;;  %v271_v38 = vld [vmem:[%s5060_s2 + $0x20] sm:$0xff] }
 0x5ad   :  { %4055 = vrcp.f32 %v796_v28 }
 0x5af   :  { %v799_v40 = vpop.xlane.xlu1 %798 }
 0x5b0   :  { %4057 = vrcp.f32 %v799_v40  ;;  %v272_v40 = vld [vmem:[%s5060_s2 + $0x28] sm:$0xff] }
 0x5b1   :  { %4059 = vrcp.f32 %v802_v31  ;;  %v3951_v46 = vpack.i.bf16 %v272_v40, %v271_v38 }
 0x5b3   :  { %v3938_v42 = vpop.permute.xlu1 %3937 }
 0x5b4   :  { %v3940_v44 = vunpack.i.h.bf16 %v3938_v42  ;;  %v3939_v45 = vunpack.i.l.bf16 %v3938_v42  ;;  %v3777_v42 = vpack.c.bf16 %v272_v40, %v271_v38 }
 0x5b6   :  { %v4054_v47 = vpop.eup %4053  ;;  %v3765_v49 = vpack.c.bf16 %v3940_v44, %v3939_v45  ;;  %3778 = vmatprep.subr.bf16.mxu0 %v3777_v42  ;;  %v274_v44 = vld [vmem:[%s5060_s2 + $0x38] sm:$0xff] }
 0x5b7   :  { %v539_v50 = vmul.f32 %v4054_v47, %v4042_v23  ;;  %v4056_v51 = vpop.eup %4055  ;;  %v3948_v11 = vpop.permute.xlu1 %3947  ;;  %3780 = vmatpush3.bf16.msra.mxu0 %v3777_v42  ;;  %v3781_v45 = vpack.c.bf16 %v274_v44, %v273_v43  ;;  %v3956_v47 = vpack.i.bf16 %v274_v44, %v273_v43 }
 0x5b8   :  { %3766 = vmatprep.subr.bf16.mxu1 %v3765_v49  ;;  %v808_v57 = vmul.f32 %v4056_v51, %v4452_v9  ;;  %v3950_v12 = vunpack.i.h.bf16 %v3948_v11  ;;  %v3949_v9 = vunpack.i.l.bf16 %v3948_v11 }
 0x5b9   :  { %3478 = vmatprep.mubr.msk.f32.mxu1 %vm154_vm4, %v539_v50  ;;  %3768 = vmatpush3.bf16.msra.mxu1 %v3765_v49 }
 0x5ba   :  { %v4058_v30 = vpop.eup %4057  ;;  %3479 = vmatmul.mubr.msk.f32.gmra.mrb[10].mxu1 %vm154_vm4, %v540_v29  ;;  %3770 = vmatprep.subr.bf16.mxu1 %v3769_v8  ;;  %v3773_v15 = vpack.c.bf16 %v3950_v12, %v3949_v9 }
 0x5bb   :  { %3503 = vmatprep.mubr.msk.f32.mxu1 %vm154_vm4, %v807_v52  ;;  %v4060_v39 = vpop.eup %4059  ;;  %v809_v58 = vmul.f32 %v4058_v30, %v4471_v25  ;;  %v1132_v25 = vpop.permute.xlu0 %1131  ;;  %3782 = vmatprep.subr.bf16.mxu0 %v3781_v45 }
 0x5bc   :  { %v810_v55 = vmul.f32 %v4060_v39, %v4460_v16  ;;  %3784 = vmatpush3.bf16.msra.mxu0 %v3781_v45 }
 0x5be   :  { %3504 = vmatmul.mubr.msk.f32.vlgmr.msra.gmra.mrb[12].mxu1 %vm154_vm4, %v808_v57 }
 0x5bf   :  { %3506 = vmatprep.mubr.msk.f32.mxu1 %vm154_vm4, %v809_v58  ;;  %3772 = vmatpush3.bf16.msra.mxu1 %v3769_v8 }
 0x5c0   :  { %3774 = vmatprep.subr.bf16.mxu1 %v3773_v15 }
 0x5c2   :  { %3507 = vmatmul.mubr.msk.f32.gmra.mrb[14].mxu1 %vm154_vm4, %v810_v55 }
 0x666   :  { %v3477_v17 = vpop.f32.mrb[8].mxu1 }
 0x667   :  { %v631_v18 = vpop.f32.mrb[9].mxu1 }
 0x68d   :  { %v3480_v19 = vpop.f32.mrb[10].mxu1 }
 0x68e   :  { %v641_v20 = vpop.f32.mrb[11].mxu1 }
 0x691   :  { %v3505_v22 = vpop.f32.mrb[12].mxu1 }
 0x692   :  { %v901_v23 = vpop.f32.mrb[13].mxu1 }
 0x693   :  { %3513 = vmatprep.mubr.msk.f32.mxu1 %vm395_vm5, %v901_v23 }
 0x694   :  { %3514 = vmatmul.mubr.msk.f32.vlgmr.msra.gmra.mrb[16].mxu1 %vm395_vm5, %v3505_v22 }
 0x695   :  { %3776 = vmatpush3.bf16.msra.mxu1 %v3773_v15  ;;  %v3508_v16 = vpop.f32.mrb[14].mxu1 }
 0x696   :  { %v911_v24 = vpop.f32.mrb[15].mxu1 }
 0x697   :  { %3516 = vmatprep.mubr.msk.f32.mxu1 %vm395_vm5, %v911_v24 }
 0x698   :  { %3517 = vmatmul.mubr.msk.f32.gmra.mrb[18].mxu1 %vm395_vm5, %v3508_v16 }
 0x699   :  { %3523 = vmatprep.mubr.msk.f32.mxu1 %vm395_vm5, %v631_v18 }
 0x69c   :  { %3524 = vmatmul.mubr.msk.f32.vlgmr.msra.gmra.mrb[16].mxu1 %vm395_vm5, %v3477_v17 }
 0x69d   :  { %3526 = vmatprep.mubr.msk.f32.mxu1 %vm395_vm5, %v641_v20 }
 0x6a0   :  { %3527 = vmatmul.mubr.msk.f32.gmra.mrb[18].mxu1 %vm395_vm5, %v3480_v19 }
 0x76f   :  { %v3525_v5 = vpop.f32.mrb[16].mxu1 }
 0x770   :  { %v1135_v13 = vadd.f32 %v3525_v5, %v1132_v25  ;;  %v1111_v21 = vpop.f32.mrb[17].mxu1 }
 0x771   :  { %v1134_v26 = vadd.f32 %v1132_v25, %v1111_v21 }
 0x772   :  { %v4509_v27 = vadd.f32 %v1135_v13, %v4340_v56 }
 0x773   :  { %v4512_v28 = vadd.f32 %v1134_v26, %v4334_v41  ;;  %v3528_v10 = vpop.f32.mrb[18].mxu1 }
 0x774   :  { %v1137_v0 = vadd.f32 %v3528_v10, %v1132_v25  ;;  %v1121_v1 = vpop.f32.mrb[19].mxu1  ;;  %v1145_v31 = vsel %vm154_vm4, %v4509_v27, 0.0  ;;  %v1159_v56 = vmul.f32 %v4509_v27, %v4509_v27 }
 0x775   :  { %v1136_v32 = vadd.f32 %v1132_v25, %v1121_v1  ;;  %1146 = vadd.xlane.f32.xlu0 %v1145_v31  ;;  %v1142_v60 = vsel %vm154_vm4, %v4512_v28, 0.0  ;;  %v1158_v61 = vmul.f32 %v4512_v28, %v4512_v28 }
 0x776   :  { %1143 = vadd.xlane.f32.xlu1 %v1142_v60  ;;  %v4527_v33 = vadd.f32 %v1137_v0, %v4347_v59  ;;  %v1165_v34 = vsel %vm154_vm4, %v1159_v56, 0.0 }
 0x777   :  { %v1162_v41 = vsel %vm154_vm4, %v1158_v61, 0.0  ;;  %v4524_v62 = vadd.f32 %v1136_v32, %v4338_v54  ;;  %v3159_v32 = vld [vmem:[%s5059_s3 + $0xa2] ss:$0 sm:$0xff] }
 0x778   :  { %v1151_v36 = vsel %vm154_vm4, %v4527_v33, 0.0  ;;  %v1161_v54 = vmul.f32 %v4527_v33, %v4527_v33 }
 0x779   :  { %1163 = vadd.xlane.f32.xlu0 %v1162_v41  ;;  %v1148_v35 = vsel %vm154_vm4, %v4524_v62, 0.0  ;;  %v1160_v63 = vmul.f32 %v4524_v62, %v4524_v62  ;;  %v3160_v41 = vld [vmem:[%s5059_s3 + $0xa3] ss:$0 sm:$0xff] }
 0x77a   :  { %1166 = vadd.xlane.f32.xlu1 %v1165_v34  ;;  %v1171_v37 = vsel %vm154_vm4, %v1161_v54, 0.0 }
 0x77b   :  { %v1168_v59 = vsel %vm154_vm4, %v1160_v63, 0.0 }
 0x77d   :  { %1149 = vadd.xlane.f32.xlu0 %v1148_v35 }
 0x77e   :  { %1152 = vadd.xlane.f32.xlu1 %v1151_v36 }
 0x781   :  { %1169 = vadd.xlane.f32.xlu0 %v1168_v59 }
 0x782   :  { %1172 = vadd.xlane.f32.xlu1 %v1171_v37 }
 0x793   :  { %3957 = vrot.lane.b32.xlu1 %v3956_v47, %s4163_s1 }
 0x797   :  { %3952 = vrot.lane.b32.xlu0 %v3951_v46, %s4163_s1 }
 0x802   :  { %v1147_v49 = vpop.xlane.xlu0 %1146 }
 0x803   :  { %v1144_v50 = vpop.xlane.xlu1 %1143  ;;  %v1155_v29 = vmul.f32 0.03125, %v1147_v49 }
 0x804   :  { %v1154_v51 = vmul.f32 0.03125, %v1144_v50 }
 0x805   :  { %v1179_v58 = vmul.f32 %v1155_v29, %v1155_v29  ;;  %v1191_v31 = vsub.f32 %v4509_v27, %v1155_v29 }
 0x806   :  { %v1178_v52 = vmul.f32 %v1154_v51, %v1154_v51  ;;  %v1164_v30 = vpop.xlane.xlu0 %1163  ;;  %v1190_v0 = vsub.f32 %v4512_v28, %v1154_v51 }
 0x807   :  { %v1174_v57 = vmul.f32 0.03125, %v1164_v30  ;;  %v1167_v39 = vpop.xlane.xlu1 %1166 }
 0x808   :  { %v1175_v55 = vmul.f32 0.03125, %v1167_v39 }
 0x809   :  { %v1182_v2 = vsub.f32 %v1174_v57, %v1178_v52  ;;  %v3161_v52 = vld [vmem:[%s5060_s2 + $0xa1] ss:$0 sm:$0xff] }
 0x80a   :  { %v1183_v4 = vsub.f32 %v1175_v55, %v1179_v58  ;;  %v1150_v6 = vpop.xlane.xlu0 %1149 }
 0x80b   :  { %v1186_v8 = vmax.f32 %v1182_v2, 0.0  ;;  %v1156_v11 = vmul.f32 0.03125, %v1150_v6  ;;  %v1153_v12 = vpop.xlane.xlu1 %1152 }
 0x80c   :  { %v1187_v9 = vmax.f32 %v1183_v4, 0.0  ;;  %v1157_v15 = vmul.f32 0.03125, %v1153_v12 }
 0x80d   :  { %v1194_v17 = vadd.f32 1e-12, %v1186_v8  ;;  %v1180_v20 = vmul.f32 %v1156_v11, %v1156_v11  ;;  %v1192_v36 = vsub.f32 %v4524_v62, %v1156_v11 }
 0x80e   :  { %v1195_v18 = vadd.f32 1e-12, %v1187_v9  ;;  %v1170_v19 = vpop.xlane.xlu0 %1169  ;;  %v1181_v16 = vmul.f32 %v1157_v15, %v1157_v15  ;;  %v1193_v54 = vsub.f32 %v4527_v33, %v1157_v15 }
 0x80f   :  { %4061 = vrsqrt.f32 %v1194_v17  ;;  %v1176_v22 = vmul.f32 0.03125, %v1170_v19  ;;  %v1173_v23 = vpop.xlane.xlu1 %1172 }
 0x810   :  { %4063 = vrsqrt.f32 %v1195_v18  ;;  %v1177_v24 = vmul.f32 0.03125, %v1173_v23 }
 0x811   :  { %v1184_v25 = vsub.f32 %v1176_v22, %v1180_v20 }
 0x812   :  { %v1185_v5 = vsub.f32 %v1177_v24, %v1181_v16  ;;  %v3953_v62 = vpop.permute.xlu0 %3952 }
 0x813   :  { %v1188_v13 = vmax.f32 %v1184_v25, 0.0  ;;  %v3955_v33 = vunpack.i.h.bf16 %v3953_v62  ;;  %v3954_v45 = vunpack.i.l.bf16 %v3953_v62  ;;  %v3958_v49 = vpop.permute.xlu1 %3957 }
 0x814   :  { %v1189_v21 = vmax.f32 %v1185_v5, 0.0  ;;  %v3960_v50 = vunpack.i.h.bf16 %v3958_v49  ;;  %v3959_v29 = vunpack.i.l.bf16 %v3958_v49 }
 0x815   :  { %v1196_v26 = vadd.f32 1e-12, %v1188_v13  ;;  %v3785_v46 = vpack.c.bf16 %v3955_v33, %v3954_v45 }
 0x816   :  { %v1197_v10 = vadd.f32 1e-12, %v1189_v21  ;;  %v3791_v51 = vpack.c.bf16 %v3960_v50, %v3959_v29 }
 0x817   :  { %4065 = vrsqrt.f32 %v1196_v26  ;;  %3787 = vmatprep.subr.msk.bf16.mxu0 %vm4582_vm12, %v3785_v46 }
 0x818   :  { %4067 = vrsqrt.f32 %v1197_v10 }
 0x819   :  { %v4062_v1 = vpop.eup %4061 }
 0x81a   :  { %v4064_v60 = vpop.eup %4063  ;;  %v1202_v61 = vmul.f32 %v4062_v1, %v1190_v0 }
 0x81b   :  { %v1203_v56 = vmul.f32 %v4064_v60, %v1191_v31 }
 0x81c   :  { %v1210_v34 = vmul.f32 %v3159_v32, %v1202_v61 }
 0x81d   :  { %v1211_v35 = vmul.f32 %v3159_v32, %v1203_v56 }
 0x81e   :  { %v4562_v63 = vadd.f32 %v3160_v41, %v1210_v34 }
 0x81f   :  { %v4564_v28 = vadd.f32 %v3160_v41, %v1211_v35 }
 0x820   :  { %3537 = vmatprep.mubr.msk.f32.mxu0 %vm154_vm4, %v4562_v63 }
 0x821   :  { %v4066_v27 = vpop.eup %4065  ;;  %3538 = vmatmul.mubr.msk.f32.vlgmr.msra.gmra.mrb[8].mxu0 %vm154_vm4, %v4564_v28 }
 0x822   :  { %v4068_v59 = vpop.eup %4067  ;;  %v1204_v37 = vmul.f32 %v4066_v27, %v1192_v36  ;;  %3790 = vmatpush3.bf16.xpose.msk.msra.mxu0 %vm4582_vm12, %v3785_v46 }
 0x823   :  { %v1205_v38 = vmul.f32 %v4068_v59, %v1193_v54  ;;  %3793 = vmatprep.subr.msk.bf16.mxu0 %vm4582_vm12, %v3791_v51 }
 0x824   :  { %v1212_v40 = vmul.f32 %v3159_v32, %v1204_v37 }
 0x825   :  { %v1213_v42 = vmul.f32 %v3159_v32, %v1205_v38 }
 0x826   :  { %v4572_v43 = vadd.f32 %v3160_v41, %v1212_v40 }
 0x827   :  { %v4574_v44 = vadd.f32 %v3160_v41, %v1213_v42 }
 0x828   :  { %3540 = vmatprep.mubr.msk.f32.mxu0 %vm154_vm4, %v4572_v43 }
 0x829   :  { %3541 = vmatmul.mubr.msk.f32.gmra.mrb[10].mxu0 %vm154_vm4, %v4574_v44 }
 0x82a   :  { %3796 = vmatpush3.bf16.xpose.msk.msra.mxu0 %vm4582_vm12, %v3791_v51 }
 0x8f4   :  { %v3539_v30 = vpop.f32.mrb[8].mxu0 }
 0x8f5   :  { %v4597_v57 = vadd.f32 %v3539_v30, %v3161_v52  ;;  %v1304_v39 = vpop.f32.mrb[9].mxu0 }
 0x8f6   :  { %v4599_v58 = vadd.f32 %v3161_v52, %v1304_v39 }
 0x8f7   :  { %v4602_v55 = vmul.f32 0.70710677, %v4597_v57 }
 0x8f8   :  { %v4605_v2 = vmul.f32 0.70710677, %v4599_v58 }
 0x8f9   :  { %v1340_v4 = vand.u32 2147483647, %v4602_v55  ;;  %vm1332_vm13 = vcmp.ge.f32.partialorder %v4602_v55, 0.0 }
 0x8fa   :  { %v1339_v6 = vand.u32 2147483647, %v4605_v2  ;;  %vm1331_vm14 = vcmp.ge.f32.partialorder %v4605_v2, 0.0  ;;  %v1323_v2 = vmul.f32 0.5, %v4599_v58 }
 0x8fb   :  { %v1344_v8 = vmul.f32 0.3275911, %v1340_v4  ;;  %v1392_v5 = vsub.f32 0.0, %v1340_v4 }
 0x8fc   :  { %v1343_v11 = vmul.f32 0.3275911, %v1339_v6  ;;  %v3542_v12 = vpop.f32.mrb[10].mxu0  ;;  %v1391_v21 = vsub.f32 0.0, %v1339_v6 }
 0x8fd   :  { %v1348_v9 = vadd.f32 1.0, %v1344_v8  ;;  %v4609_v15 = vadd.f32 %v3542_v12, %v3161_v52  ;;  %v1314_v17 = vpop.f32.mrb[11].mxu0  ;;  %v1396_v0 = vmul.f32 %v1392_v5, %v1340_v4 }
 0x8fe   :  { %v1347_v18 = vadd.f32 1.0, %v1343_v11  ;;  %v4611_v19 = vadd.f32 %v3161_v52, %v1314_v17  ;;  %v1395_v32 = vmul.f32 %v1391_v21, %v1339_v6 }
 0x8ff   :  { %4069 = vrcp.f32 %v1348_v9  ;;  %v4614_v20 = vmul.f32 0.70710677, %v4609_v15  ;;  %v1401_v56 = vmul.f32 1.442695, %v1396_v0 }
 0x900   :  { %4071 = vrcp.f32 %v1347_v18  ;;  %v4617_v22 = vmul.f32 0.70710677, %v4611_v19  ;;  %v1399_v36 = vmul.f32 1.442695, %v1395_v32 }
 0x901   :  { %v1342_v23 = vand.u32 2147483647, %v4614_v20  ;;  %vm1334_vm15 = vcmp.ge.f32.partialorder %v4614_v20, 0.0  ;;  %v1325_v20 = vmul.f32 0.5, %v4611_v19 }
 0x902   :  { %v1341_v16 = vand.u32 2147483647, %v4617_v22  ;;  %vm1333_vm0 = vcmp.ge.f32.partialorder %v4617_v22, 0.0  ;;  %v1326_v22 = vmul.f32 0.5, %v4609_v15 }
 0x903   :  { %v1346_v24 = vmul.f32 0.3275911, %v1342_v23  ;;  %v1394_v34 = vsub.f32 0.0, %v1342_v23 }
 0x904   :  { %v1345_v25 = vmul.f32 0.3275911, %v1341_v16  ;;  %v1393_v27 = vsub.f32 0.0, %v1341_v16 }
 0x905   :  { %v1350_v13 = vadd.f32 1.0, %v1346_v24  ;;  %v1398_v40 = vmul.f32 %v1394_v34, %v1342_v23 }
 0x906   :  { %v1349_v26 = vadd.f32 1.0, %v1345_v25  ;;  %v1397_v45 = vmul.f32 %v1393_v27, %v1341_v16 }
 0x907   :  { %4073 = vrcp.f32 %v1350_v13  ;;  %v1405_v52 = vmul.f32 1.442695, %v1398_v40 }
 0x908   :  { %4075 = vrcp.f32 %v1349_v26  ;;  %v1403_v6 = vmul.f32 1.442695, %v1397_v45 }
 0x909   :  { %v4070_v10 = vpop.eup %4069  ;;  %4077 = vpow2.f32 %v1401_v56 }
 0x90a   :  { %v4072_v1 = vpop.eup %4071  ;;  %v1356_v31 = vmul.f32 1.0614054, %v4070_v10  ;;  %4079 = vpow2.f32 %v1399_v36 }
 0x90b   :  { %v1355_v60 = vmul.f32 1.0614054, %v4072_v1  ;;  %4081 = vpow2.f32 %v1405_v52 }
 0x90c   :  { %v1360_v61 = vadd.f32 -1.4531521, %v1356_v31  ;;  %4083 = vpow2.f32 %v1403_v6  ;;  %v3166_v6 = vld [vmem:[%s5059_s3 + $0xa6] ss:$0 sm:$0xff] }
 0x90d   :  { %v1359_v41 = vadd.f32 -1.4531521, %v1355_v60 }
 0x90e   :  { %v1364_v35 = vmul.f32 %v4070_v10, %v1360_v61  ;;  %v4166_v61 = vmov -1.0  }
 0x90f   :  { %v1363_v54 = vmul.f32 %v4072_v1, %v1359_v41  ;;  %v1336_v56 = vsel %vm1332_vm13, 1.0, %v4166_v61 }
 0x910   :  { %v1368_v59 = vadd.f32 1.4214138, %v1364_v35 }
 0x911   :  { %v4074_v37 = vpop.eup %4073  ;;  %v1367_v38 = vadd.f32 1.4214138, %v1363_v54 }
 0x912   :  { %v4076_v42 = vpop.eup %4075  ;;  %v1372_v62 = vmul.f32 %v4070_v10, %v1368_v59  ;;  %v1358_v33 = vmul.f32 1.0614054, %v4074_v37 }
 0x913   :  { %v1371_v46 = vmul.f32 %v4072_v1, %v1367_v38  ;;  %v1357_v49 = vmul.f32 1.0614054, %v4076_v42  ;;  %v4078_v16 = vpop.eup %4077 }
 0x914   :  { %v1376_v50 = vadd.f32 -0.28449672, %v1372_v62  ;;  %v1362_v29 = vadd.f32 -1.4531521, %v1358_v33  ;;  %v4080_v13 = vpop.eup %4079  ;;  %v1324_v33 = vmul.f32 0.5, %v4597_v57 }
 0x915   :  { %v1375_v51 = vadd.f32 -0.28449672, %v1371_v46  ;;  %v1361_v30 = vadd.f32 -1.4531521, %v1357_v49  ;;  %v4082_v59 = vpop.eup %4081 }
 0x916   :  { %v1380_v39 = vmul.f32 %v4070_v10, %v1376_v50  ;;  %v1366_v4 = vmul.f32 %v4074_v37, %v1362_v29  ;;  %v4084_v62 = vpop.eup %4083 }
 0x917   :  { %v1379_v8 = vmul.f32 %v4072_v1, %v1375_v51  ;;  %v1365_v11 = vmul.f32 %v4076_v42, %v1361_v30  ;;  %v1338_v51 = vsel %vm1334_vm15, 1.0, %v4166_v61 }
 0x918   :  { %v1384_v12 = vadd.f32 0.2548296, %v1380_v39  ;;  %v1370_v9 = vadd.f32 1.4214138, %v1366_v4 }
 0x919   :  { %v1383_v17 = vadd.f32 0.2548296, %v1379_v8  ;;  %v1369_v18 = vadd.f32 1.4214138, %v1365_v11 }
 0x91a   :  { %v1388_v23 = vmul.f32 %v4070_v10, %v1384_v12  ;;  %v1374_v24 = vmul.f32 %v4074_v37, %v1370_v9 }
 0x91b   :  { %v1387_v25 = vmul.f32 %v4072_v1, %v1383_v17  ;;  %v1373_v5 = vmul.f32 %v4076_v42, %v1369_v18  ;;  %v1335_v1 = vsel %vm1331_vm14, 1.0, %v4166_v61 }
 0x91c   :  { %v1408_v21 = vmul.f32 %v4078_v16, %v1388_v23  ;;  %v1378_v26 = vadd.f32 -0.28449672, %v1374_v24 }
 0x91d   :  { %v1407_v0 = vmul.f32 %v4080_v13, %v1387_v25  ;;  %v1377_v31 = vadd.f32 -0.28449672, %v1373_v5 }
 0x91e   :  { %v1412_v32 = vsub.f32 1.0, %v1408_v21  ;;  %v1382_v60 = vmul.f32 %v4074_v37, %v1378_v26 }
 0x91f   :  { %v1411_v10 = vsub.f32 1.0, %v1407_v0  ;;  %v1381_v41 = vmul.f32 %v4076_v42, %v1377_v31 }
 0x920   :  { %v1416_v34 = vmul.f32 %v1412_v32, %v1336_v56  ;;  %v1386_v35 = vadd.f32 0.2548296, %v1382_v60 }
 0x921   :  { %v1415_v36 = vmul.f32 %v1411_v10, %v1335_v1  ;;  %v1385_v27 = vadd.f32 0.2548296, %v1381_v41  ;;  %v4680_v10 = vld [vmem:[%s5060_s2 + $0x48] sm:$0xff]  ;;  %v4692_v1 = vld [vmem:[%s5060_s2 + $0x58] sm:$0xff] }
 0x922   :  { %v1420_v55 = vadd.f32 1.0, %v1416_v34  ;;  %v1390_v54 = vmul.f32 %v4074_v37, %v1386_v35  ;;  %v4687_v34 = vld [vmem:[%s5060_s2 + $0x50] sm:$0xff] }
 0x923   :  { %v1419_v38 = vadd.f32 1.0, %v1415_v36  ;;  %v1389_v40 = vmul.f32 %v4076_v42, %v1385_v27  ;;  %v1337_v42 = vsel %vm1333_vm0, 1.0, %v4166_v61  ;;  %v3801_v35 = vpack.c.bf16 %v4692_v1, %v4687_v34 }
 0x924   :  { %v1410_v45 = vmul.f32 %v4082_v59, %v1390_v54  ;;  %v1424_v50 = vmul.f32 %v1420_v55, %v1324_v33 }
 0x925   :  { %v1423_v46 = vmul.f32 %v1419_v38, %v1323_v2  ;;  %v1409_v49 = vmul.f32 %v4084_v62, %v1389_v40 }
 0x926   :  { %v1414_v29 = vsub.f32 1.0, %v1410_v45 }
 0x927   :  { %v1413_v37 = vsub.f32 1.0, %v1409_v49  ;;  %3551 = vmatprep.mubr.msk.f32.mxu0 %vm1443_vm11, %v1423_v46 }
 0x928   :  { %v1418_v58 = vmul.f32 %v1414_v29, %v1338_v51  ;;  %3552 = vmatmul.mubr.msk.f32.vlgmr.msra.gmra.mrb[12].mxu0 %vm1443_vm11, %v1424_v50 }
 0x929   :  { %v1417_v57 = vmul.f32 %v1413_v37, %v1337_v42 }
 0x92a   :  { %v1422_v52 = vadd.f32 1.0, %v1418_v58 }
 0x92b   :  { %v1421_v30 = vadd.f32 1.0, %v1417_v57 }
 0x92c   :  { %v1426_v4 = vmul.f32 %v1422_v52, %v1326_v22 }
 0x92d   :  { %v1425_v39 = vmul.f32 %v1421_v30, %v1325_v20 }
 0x92f   :  { %3554 = vmatprep.mubr.msk.f32.mxu0 %vm1443_vm11, %v1425_v39 }
 0x930   :  { %3555 = vmatmul.mubr.msk.f32.gmra.mrb[14].mxu0 %vm1443_vm11, %v1426_v4 }
 0x9fb   :  { %v3553_v8 = vpop.f32.mrb[12].mxu0 }
 0x9fc   :  { %v1536_v11 = vadd.f32 %v3553_v8, %v3166_v6  ;;  %v1530_v12 = vpop.f32.mrb[13].mxu0 }
 0x9fd   :  { %v1531_v9 = vadd.f32 %v3166_v6, %v1530_v12 }
 0x9fe   :  { %v4641_v17 = vadd.f32 %v1536_v11, %v4564_v28 }
 0x9ff   :  { %v4644_v19 = vadd.f32 %v1531_v9, %v4562_v63 }
 0xa00   :  { %v1556_v15 = vsel %vm154_vm4, %v4641_v17, 0.0  ;;  %v1570_v24 = vmul.f32 %v4641_v17, %v4641_v17 }
 0xa01   :  { %1557 = vadd.xlane.f32.xlu0 %v1556_v15  ;;  %v1553_v18 = vsel %vm154_vm4, %v4644_v19, 0.0  ;;  %v1569_v23 = vmul.f32 %v4644_v19, %v4644_v19 }
 0xa02   :  { %1554 = vadd.xlane.f32.xlu1 %v1553_v18  ;;  %v1576_v13 = vsel %vm154_vm4, %v1570_v24, 0.0 }
 0xa03   :  { %v3556_v16 = vpop.f32.mrb[14].mxu0  ;;  %v1573_v28 = vsel %vm154_vm4, %v1569_v23, 0.0 }
 0xa04   :  { %v1546_v25 = vadd.f32 %v3556_v16, %v3166_v6  ;;  %v1540_v63 = vpop.f32.mrb[15].mxu0  ;;  %v3175_v16 = vld [vmem:[%s5059_s3 + $0xa4] ss:$0 sm:$0xff] }
 0xa05   :  { %v1541_v5 = vadd.f32 %v3166_v6, %v1540_v63  ;;  %1574 = vadd.xlane.f32.xlu0 %v1573_v28 }
 0xa06   :  { %v4657_v21 = vadd.f32 %v1546_v25, %v4574_v44  ;;  %1577 = vadd.xlane.f32.xlu1 %v1576_v13 }
 0xa07   :  { %v4660_v26 = vadd.f32 %v1541_v5, %v4572_v43  ;;  %v4675_v43 = vld [vmem:[%s5060_s2 + $0x40] sm:$0xff] }
 0xa08   :  { %v1562_v0 = vsel %vm154_vm4, %v4657_v21, 0.0  ;;  %v1572_v60 = vmul.f32 %v4657_v21, %v4657_v21  ;;  %v3797_v41 = vpack.c.bf16 %v4680_v10, %v4675_v43  ;;  %v3176_v5 = vld [vmem:[%s5059_s3 + $0xa5] ss:$0 sm:$0xff] }
 0xa09   :  { %v1559_v31 = vsel %vm154_vm4, %v4660_v26, 0.0  ;;  %v1571_v32 = vmul.f32 %v4660_v26, %v4660_v26 }
 0xa0a   :  { %1560 = vadd.xlane.f32.xlu0 %v1559_v31  ;;  %1563 = vadd.xlane.f32.xlu1 %v1562_v0  ;;  %v1582_v56 = vsel %vm154_vm4, %v1572_v60, 0.0 }
 0xa0b   :  { %v1579_v44 = vsel %vm154_vm4, %v1571_v32, 0.0  ;;  %3798 = vmatprep.subr.bf16.mxu1 %v3797_v41 }
 0xa0c   :  { %3800 = vmatpush3.bf16.msra.mxu1 %v3797_v41 }
 0xa0d   :  { %3802 = vmatprep.subr.bf16.mxu1 %v3801_v35 }
 0xa0e   :  { %1580 = vadd.xlane.f32.xlu0 %v1579_v44  ;;  %1583 = vadd.xlane.f32.xlu1 %v1582_v56 }
 0xa10   :  { %3804 = vmatpush3.bf16.msra.mxu1 %v3801_v35 }
 0xa8e   :  { %v1558_v36 = vpop.xlane.xlu0 %1557 }
 0xa8f   :  { %v1555_v27 = vpop.xlane.xlu1 %1554  ;;  %v1566_v55 = vmul.f32 0.03125, %v1558_v36 }
 0xa90   :  { %v1565_v54 = vmul.f32 0.03125, %v1555_v27 }
 0xa91   :  { %v1590_v62 = vmul.f32 %v1566_v55, %v1566_v55  ;;  %v1602_v24 = vsub.f32 %v4641_v17, %v1566_v55 }
 0xa92   :  { %v1589_v59 = vmul.f32 %v1565_v54, %v1565_v54  ;;  %v1575_v2 = vpop.xlane.xlu0 %1574  ;;  %v1601_v18 = vsub.f32 %v4644_v19, %v1565_v54 }
 0xa93   :  { %v1585_v38 = vmul.f32 0.03125, %v1575_v2  ;;  %v1578_v40 = vpop.xlane.xlu1 %1577 }
 0xa94   :  { %v1586_v33 = vmul.f32 0.03125, %v1578_v40 }
 0xa95   :  { %v1593_v45 = vsub.f32 %v1585_v38, %v1589_v59 }
 0xa96   :  { %v1594_v46 = vsub.f32 %v1586_v33, %v1590_v62 }
 0xa97   :  { %v1597_v49 = vmax.f32 %v1593_v45, 0.0  ;;  %v1561_v50 = vpop.xlane.xlu0 %1560  ;;  %v1564_v29 = vpop.xlane.xlu1 %1563 }
 0xa98   :  { %v1598_v51 = vmax.f32 %v1594_v46, 0.0  ;;  %v1567_v37 = vmul.f32 0.03125, %v1561_v50  ;;  %v1568_v58 = vmul.f32 0.03125, %v1564_v29 }
 0xa99   :  { %v1605_v42 = vadd.f32 1e-12, %v1597_v49 }
 0xa9a   :  { %v1606_v57 = vadd.f32 1e-12, %v1598_v51  ;;  %v1591_v52 = vmul.f32 %v1567_v37, %v1567_v37  ;;  %v1592_v22 = vmul.f32 %v1568_v58, %v1568_v58  ;;  %v1603_v17 = vsub.f32 %v4660_v26, %v1567_v37  ;;  %v4725_v26 = vld [vmem:[%s5060_s2 + $0xa2] ss:$0 sm:$0xff] }
 0xa9b   :  { %4085 = vrsqrt.f32 %v1605_v42  ;;  %v1581_v20 = vpop.xlane.xlu0 %1580  ;;  %v1584_v30 = vpop.xlane.xlu1 %1583  ;;  %v1604_v60 = vsub.f32 %v4657_v21, %v1568_v58 }
 0xa9c   :  { %4087 = vrsqrt.f32 %v1606_v57  ;;  %v1587_v39 = vmul.f32 0.03125, %v1581_v20  ;;  %v1588_v4 = vmul.f32 0.03125, %v1584_v30 }
 0xa9e   :  { %v1595_v6 = vsub.f32 %v1587_v39, %v1591_v52  ;;  %v1596_v8 = vsub.f32 %v1588_v4, %v1592_v22 }
 0xaa0   :  { %v1599_v11 = vmax.f32 %v1595_v6, 0.0  ;;  %v1600_v12 = vmax.f32 %v1596_v8, 0.0 }
 0xaa2   :  { %v1607_v9 = vadd.f32 1e-12, %v1599_v11  ;;  %v1608_v15 = vadd.f32 1e-12, %v1600_v12 }
 0xaa4   :  { %4089 = vrsqrt.f32 %v1607_v9 }
 0xaa5   :  { %v4086_v23 = vpop.eup %4085  ;;  %4091 = vrsqrt.f32 %v1608_v15 }
 0xaa6   :  { %v4088_v28 = vpop.eup %4087  ;;  %v1613_v25 = vmul.f32 %v4086_v23, %v1601_v18 }
 0xaa7   :  { %v1614_v63 = vmul.f32 %v4088_v28, %v1602_v24 }
 0xaa8   :  { %v1621_v13 = vmul.f32 %v3175_v16, %v1613_v25 }
 0xaa9   :  { %v1622_v0 = vmul.f32 %v3175_v16, %v1614_v63 }
 0xaaa   :  { %v4704_v31 = vadd.f32 %v3176_v5, %v1621_v13 }
 0xaab   :  { %v4706_v19 = vadd.f32 %v3176_v5, %v1622_v0 }
 0xaac   :  { %3565 = vmatprep.mubr.msk.f32.mxu1 %vm154_vm4, %v4704_v31 }
 0xaad   :  { %3566 = vmatmul.mubr.msk.f32.vlgmr.msra.gmra.mrb[20].mxu1 %vm154_vm4, %v4706_v19 }
 0xaae   :  { %v4090_v32 = vpop.eup %4089 }
 0xaaf   :  { %v4092_v44 = vpop.eup %4091  ;;  %v1615_v56 = vmul.f32 %v4090_v32, %v1603_v17 }
 0xab0   :  { %v1616_v41 = vmul.f32 %v4092_v44, %v1604_v60 }
 0xab1   :  { %v1623_v35 = vmul.f32 %v3175_v16, %v1615_v56 }
 0xab2   :  { %v1624_v36 = vmul.f32 %v3175_v16, %v1616_v41 }
 0xab3   :  { %v4714_v27 = vadd.f32 %v3176_v5, %v1623_v35 }
 0xab4   :  { %v4716_v55 = vadd.f32 %v3176_v5, %v1624_v36 }
 0xab5   :  { %3568 = vmatprep.mubr.msk.f32.mxu1 %vm154_vm4, %v4714_v27 }
 0xab6   :  { %3569 = vmatmul.mubr.msk.f32.gmra.mrb[22].mxu1 %vm154_vm4, %v4716_v55 }
 0xb80   :  { %v3567_v21 = vpop.f32.mrb[20].mxu1 }
 0xb81   :  { %v4728_v54 = vadd.f32 %v3567_v21, %v4725_v26  ;;  %v1730_v59 = vpop.f32.mrb[21].mxu1 }
 0xb82   :  { %v4731_v2 = vadd.f32 %v4725_v26, %v1730_v59 }
 0xb84   :  { %3579 = vmatprep.mubr.msk.f32.mxu1 %vm395_vm5, %v4731_v2  ;;  %v4737_v38 = vpack.i.bf16 %v4728_v54, %v4731_v2 }
 0xb86   :  { %3962 = vrot.lane.b32.xlu0 %v4737_v38, %s4159_s23 }
 0xb89   :  { %v3570_v40 = vpop.f32.mrb[22].mxu1 }
 0xb8a   :  { %v4742_v62 = vadd.f32 %v3570_v40, %v4725_v26  ;;  %v1740_v33 = vpop.f32.mrb[23].mxu1 }
 0xb8b   :  { %v4745_v45 = vadd.f32 %v4725_v26, %v1740_v33 }
 0xb8d   :  { %v4749_v46 = vpack.i.bf16 %v4742_v62, %v4745_v45 }
 0xb8f   :  { %3967 = vrot.lane.b32.xlu1 %v4749_v46, %s4159_s23 }
 0xbf8   :  { %v3963_v49 = vpop.permute.xlu0 %3962 }
 0xbf9   :  { %v3965_v50 = vunpack.i.h.bf16 %v3963_v49  ;;  %v3964_v29 = vunpack.i.l.bf16 %v3963_v49 }
 0xbfb   :  { %v3805_v51 = vpack.c.bf16 %v3965_v50, %v3964_v29 }
 0xbfd   :  { %3807 = vmatprep.subr.msk.bf16.mxu1 %vm4379_vm6, %v3805_v51 }
 0xbfe   :  { %3810 = vmatpush3.bf16.xpose.msk.msra.mxu1 %vm4379_vm6, %v3805_v51 }
 0xc01   :  { %v3968_v37 = vpop.permute.xlu1 %3967 }
 0xc02   :  { %v3970_v58 = vunpack.i.h.bf16 %v3968_v37  ;;  %v3969_v42 = vunpack.i.l.bf16 %v3968_v37 }
 0xc04   :  { %v3811_v57 = vpack.c.bf16 %v3970_v58, %v3969_v42 }
 0xc06   :  { %3813 = vmatprep.subr.msk.bf16.mxu1 %vm4379_vm6, %v3811_v57 }
 0xc07   :  { %3816 = vmatpush3.bf16.xpose.msk.msra.mxu1 %vm4379_vm6, %v3811_v57 }
 0xc0e   :  { %3580 = vmatmul.mubr.msk.f32.vlgmr.msra.gmra.mrb[24].mxu1 %vm395_vm5, %v4728_v54 }
 0xc0f   :  { %3582 = vmatprep.mubr.msk.f32.mxu1 %vm395_vm5, %v4745_v45 }
 0xc12   :  { %3583 = vmatmul.mubr.msk.f32.gmra.mrb[26].mxu1 %vm395_vm5, %v4742_v62 }
 0xce1   :  { %v3581_v52 = vpop.f32.mrb[24].mxu1 }
 0xce2   :  { %v1849_v20 = vadd.f32 %v3581_v52, %v4411_v53  ;;  %v1843_v30 = vpop.f32.mrb[25].mxu1 }
 0xce3   :  { %v1844_v22 = vadd.f32 %v1843_v30, %v4413_v48 }
 0xce4   :  { %v1865_v39 = vsel %vm154_vm4, %v1849_v20, -inf }
 0xce5   :  { %1866 = vmax.xlane.f32.xlu0 %v1865_v39  ;;  %v3584_v4 = vpop.f32.mrb[26].mxu1  ;;  %v1862_v6 = vsel %vm154_vm4, %v1844_v22, -inf }
 0xce6   :  { %v1859_v8 = vadd.f32 %v3584_v4, %v4420_v7  ;;  %v1853_v11 = vpop.f32.mrb[27].mxu1  ;;  %1863 = vmax.xlane.f32.xlu1 %v1862_v6 }
 0xce7   :  { %v1854_v12 = vadd.f32 %v1853_v11, %v4417_v3 }
 0xce8   :  { %v1871_v9 = vsel %vm154_vm4, %v1859_v8, -inf }
 0xce9   :  { %v1868_v15 = vsel %vm154_vm4, %v1854_v12, -inf }
 0xcea   :  { %1869 = vmax.xlane.f32.xlu0 %v1868_v15  ;;  %1872 = vmax.xlane.f32.xlu1 %v1871_v9 }
 0xcfb   :  { %3977 = vrot.lane.b32.xlu1 %v4749_v46, %s4163_s1 }
 0xd00   :  { %3972 = vrot.lane.b32.xlu0 %v4737_v38, %s4163_s1 }
 0xd72   :  { %v1867_v18 = vpop.xlane.xlu0 %1866 }
 0xd73   :  { %v1875_v23 = vsub.f32 %v1849_v20, %v1867_v18  ;;  %v1864_v24 = vpop.xlane.xlu1 %1863 }
 0xd74   :  { %v1874_v16 = vsub.f32 %v1844_v22, %v1864_v24 }
 0xd75   :  { %v1880_v28 = vmul.f32 1.442695, %v1875_v23 }
 0xd76   :  { %v1878_v25 = vmul.f32 1.442695, %v1874_v16 }
 0xd77   :  { %4093 = vpow2.f32 %v1880_v28  ;;  %v1870_v63 = vpop.xlane.xlu0 %1869  ;;  %v1873_v5 = vpop.xlane.xlu1 %1872 }
 0xd78   :  { %4095 = vpow2.f32 %v1878_v25  ;;  %v1876_v13 = vsub.f32 %v1854_v12, %v1870_v63  ;;  %v1877_v29 = vsub.f32 %v1859_v8, %v1873_v5 }
 0xd7a   :  { %v1882_v0 = vmul.f32 1.442695, %v1876_v13  ;;  %v1884_v51 = vmul.f32 1.442695, %v1877_v29 }
 0xd7b   :  { %v3973_v17 = vpop.permute.xlu0 %3972  ;;  %v3978_v32 = vpop.permute.xlu1 %3977 }
 0xd7c   :  { %4097 = vpow2.f32 %v1882_v0  ;;  %v3975_v60 = vunpack.i.h.bf16 %v3973_v17  ;;  %v3974_v44 = vunpack.i.l.bf16 %v3973_v17  ;;  %v3980_v56 = vunpack.i.h.bf16 %v3978_v32 }
 0xd7d   :  { %v3979_v41 = vunpack.i.l.bf16 %v3978_v32  ;;  %4099 = vpow2.f32 %v1884_v51 }
 0xd7e   :  { %v3817_v35 = vpack.c.bf16 %v3975_v60, %v3974_v44 }
 0xd7f   :  { %v3821_v36 = vpack.c.bf16 %v3980_v56, %v3979_v41 }
 0xd80   :  { %3818 = vmatprep.subr.bf16.mxu0 %v3817_v35 }
 0xd81   :  { %v4094_v21 = vpop.eup %4093  ;;  %3820 = vmatpush3.bf16.msra.mxu0 %v3817_v35 }
 0xd82   :  { %v4096_v59 = vpop.eup %4095  ;;  %3822 = vmatprep.subr.bf16.mxu0 %v3821_v36  ;;  %v1889_v40 = vsel %vm154_vm4, %v4094_v21, 0.0 }
 0xd83   :  { %1890 = vadd.xlane.f32.xlu1 %v1889_v40  ;;  %v1886_v33 = vsel %vm154_vm4, %v4096_v59, 0.0 }
 0xd84   :  { %1887 = vadd.xlane.f32.xlu0 %v1886_v33 }
 0xd85   :  { %3824 = vmatpush3.bf16.msra.mxu0 %v3821_v36 }
 0xd86   :  { %v4098_v49 = vpop.eup %4097 }
 0xd87   :  { %v1892_v50 = vsel %vm154_vm4, %v4098_v49, 0.0  ;;  %v4100_v37 = vpop.eup %4099 }
 0xd88   :  { %1893 = vadd.xlane.f32.xlu0 %v1892_v50  ;;  %v1895_v58 = vsel %vm154_vm4, %v4100_v37, 0.0 }
 0xd94   :  { %3982 = vrot.lane.b32.xlu1 %v4737_v38, %s4160_s24 }
 0xd9e   :  { %3987 = vrot.lane.b32.xlu0 %v4749_v46, %s4160_s24 }
 0xda2   :  { %2017 = vrot.lane.b32.xlu0 %v4728_v54, %s4161_s25 }
 0xda6   :  { %2021 = vrot.lane.b32.xlu0 %v4742_v62, %s4161_s25 }
 0xdb8   :  { %1896 = vadd.xlane.f32.xlu1 %v1895_v58 }
 0xdc9   :  { %2015 = vrot.lane.b32.xlu1 %v4731_v2, %s4161_s25 }
 0xdcd   :  { %2019 = vrot.lane.b32.xlu1 %v4745_v45, %s4161_s25 }
 0xe10   :  { %v1891_v42 = vpop.xlane.xlu1 %1890 }
 0xe11   :  { %4101 = vrcp.f32 %v1891_v42  ;;  %v1888_v57 = vpop.xlane.xlu0 %1887 }
 0xe12   :  { %4103 = vrcp.f32 %v1888_v57 }
 0xe14   :  { %v3983_v54 = vpop.permute.xlu1 %3982 }
 0xe15   :  { %v3985_v52 = vunpack.i.h.bf16 %v3983_v54  ;;  %v3984_v20 = vunpack.i.l.bf16 %v3983_v54  ;;  %v1894_v30 = vpop.xlane.xlu0 %1893 }
 0xe16   :  { %4105 = vrcp.f32 %v1894_v30 }
 0xe17   :  { %v3825_v62 = vpack.c.bf16 %v3985_v52, %v3984_v20 }
 0xe19   :  { %v3988_v22 = vpop.permute.xlu0 %3987  ;;  %3827 = vmatprep.subr.msk.bf16.mxu0 %vm4379_vm6, %v3825_v62 }
 0xe1a   :  { %v3990_v2 = vunpack.i.h.bf16 %v3988_v22  ;;  %v3989_v6 = vunpack.i.l.bf16 %v3988_v22 }
 0xe1b   :  { %v4102_v39 = vpop.eup %4101 }
 0xe1c   :  { %v4104_v4 = vpop.eup %4103  ;;  %v1903_v45 = vmul.f32 %v4102_v39, %v4094_v21  ;;  %v3831_v12 = vpack.c.bf16 %v3990_v2, %v3989_v6  ;;  %v4006_v2 = vpack.i.bf16 %v4680_v10, %v4675_v43 }
 0xe1d   :  { %v1902_v8 = vmul.f32 %v4104_v4, %v4096_v59  ;;  %v2018_v16 = vpop.permute.xlu0 %2017  ;;  %v4001_v4 = vpack.i.bf16 %v4692_v1, %v4687_v34 }
 0xe1f   :  { %3593 = vmatprep.mubr.msk.f32.mxu0 %vm154_vm4, %v1902_v8 }
 0xe20   :  { %v4106_v11 = vpop.eup %4105  ;;  %3594 = vmatmul.mubr.msk.f32.vlgmr.msra.gmra.mrb[16].mxu0 %vm154_vm4, %v1903_v45 }
 0xe21   :  { %3830 = vmatpush3.bf16.xpose.msk.msra.mxu0 %vm4379_vm6, %v3825_v62  ;;  %v1904_v9 = vmul.f32 %v4106_v11, %v4098_v49  ;;  %v2022_v25 = vpop.permute.xlu0 %2021 }
 0xe22   :  { %3833 = vmatprep.subr.msk.bf16.mxu0 %vm4379_vm6, %v3831_v12 }
 0xe23   :  { %3596 = vmatprep.mubr.msk.f32.mxu0 %vm154_vm4, %v1904_v9 }
 0xe29   :  { %3836 = vmatpush3.bf16.xpose.msk.msra.mxu0 %vm4379_vm6, %v3831_v12 }
 0xe45   :  { %v1897_v15 = vpop.xlane.xlu1 %1896 }
 0xe46   :  { %4107 = vrcp.f32 %v1897_v15 }
 0xe49   :  { %v2016_v23 = vpop.permute.xlu1 %2015 }
 0xe4d   :  { %v2020_v28 = vpop.permute.xlu1 %2019 }
 0xe50   :  { %v4108_v18 = vpop.eup %4107 }
 0xe51   :  { %v1905_v24 = vmul.f32 %v4108_v18, %v4100_v37 }
 0xe53   :  { %3597 = vmatmul.mubr.msk.f32.gmra.mrb[18].mxu0 %vm154_vm4, %v1905_v24 }
 0xe54   :  { %3607 = vmatprep.mubr.msk.f32.mxu0 %vm395_vm5, %v2016_v23 }
 0xe57   :  { %3608 = vmatmul.mubr.msk.f32.vlgmr.msra.gmra.mrb[20].mxu0 %vm395_vm5, %v2018_v16 }
 0xe58   :  { %3610 = vmatprep.mubr.msk.f32.mxu0 %vm395_vm5, %v2020_v28 }
 0xe5b   :  { %3611 = vmatmul.mubr.msk.f32.gmra.mrb[22].mxu0 %vm395_vm5, %v2022_v25 }
 0xef3   :  { %v4811_v14 = vpop.f32.mrb[16].mxu0 }
 0xef4   :  { %v4813_v63 = vpop.f32.mrb[17].mxu0 }
 0xf26   :  { %v4815_v5 = vpop.f32.mrb[18].mxu0 }
 0xf27   :  { %v4817_v13 = vpop.f32.mrb[19].mxu0 }
 0xf2a   :  { %v3609_v0 = vpop.f32.mrb[20].mxu0 }
 0xf2b   :  { %v2119_v17 = vadd.f32 %v3609_v0, %v4411_v53  ;;  %v2113_v32 = vpop.f32.mrb[21].mxu0 }
 0xf2c   :  { %v2114_v60 = vadd.f32 %v2113_v32, %v4413_v48 }
 0xf2d   :  { %v2135_v44 = vsel %vm154_vm4, %v2119_v17, -inf }
 0xf2e   :  { %2136 = vmax.xlane.f32.xlu0 %v2135_v44  ;;  %v3612_v56 = vpop.f32.mrb[22].mxu0  ;;  %v2132_v41 = vsel %vm154_vm4, %v2114_v60, -inf }
 0xf2f   :  { %v2129_v35 = vadd.f32 %v3612_v56, %v4420_v7  ;;  %v2123_v36 = vpop.f32.mrb[23].mxu0  ;;  %2133 = vmax.xlane.f32.xlu1 %v2132_v41 }
 0xf30   :  { %v2124_v21 = vadd.f32 %v2123_v36, %v4417_v3 }
 0xf31   :  { %v2141_v59 = vsel %vm154_vm4, %v2129_v35, -inf }
 0xf32   :  { %v2138_v40 = vsel %vm154_vm4, %v2124_v21, -inf }
 0xf33   :  { %2139 = vmax.xlane.f32.xlu0 %v2138_v40  ;;  %2142 = vmax.xlane.f32.xlu1 %v2141_v59 }
 0xfbb   :  { %v2137_v53 = vpop.xlane.xlu0 %2136 }
 0xfbc   :  { %v2145_v48 = vsub.f32 %v2119_v17, %v2137_v53  ;;  %v2134_v33 = vpop.xlane.xlu1 %2133 }
 0xfbd   :  { %v2144_v49 = vsub.f32 %v2114_v60, %v2134_v33 }
 0xfbe   :  { %v2150_v50 = vmul.f32 1.442695, %v2145_v48 }
 0xfbf   :  { %v2148_v29 = vmul.f32 1.442695, %v2144_v49 }
 0xfc0   :  { %4109 = vpow2.f32 %v2150_v50  ;;  %v2140_v51 = vpop.xlane.xlu0 %2139  ;;  %v2143_v37 = vpop.xlane.xlu1 %2142 }
 0xfc1   :  { %4111 = vpow2.f32 %v2148_v29  ;;  %v2146_v7 = vsub.f32 %v2124_v21, %v2140_v51  ;;  %v2147_v58 = vsub.f32 %v2129_v35, %v2143_v37 }
 0xfc3   :  { %v2152_v42 = vmul.f32 1.442695, %v2146_v7  ;;  %v2154_v3 = vmul.f32 1.442695, %v2147_v58 }
 0xfc5   :  { %4113 = vpow2.f32 %v2152_v42 }
 0xfc6   :  { %4115 = vpow2.f32 %v2154_v3 }
 0xfca   :  { %v4110_v57 = vpop.eup %4109 }
 0xfcb   :  { %v4112_v54 = vpop.eup %4111  ;;  %v2159_v52 = vsel %vm154_vm4, %v4110_v57, 0.0 }
 0xfcc   :  { %2160 = vadd.xlane.f32.xlu1 %v2159_v52  ;;  %v2156_v20 = vsel %vm154_vm4, %v4112_v54, 0.0 }
 0xfcd   :  { %2157 = vadd.xlane.f32.xlu0 %v2156_v20 }
 0xfcf   :  { %v4114_v30 = vpop.eup %4113 }
 0xfd0   :  { %v4116_v62 = vpop.eup %4115  ;;  %v2162_v22 = vsel %vm154_vm4, %v4114_v30, 0.0 }
 0xfd1   :  { %2163 = vadd.xlane.f32.xlu0 %v2162_v22  ;;  %v2165_v39 = vsel %vm154_vm4, %v4116_v62, 0.0  ;;  %v1638_v22 = vld [vmem:[%s5060_s2 + $0x68] sm:$0xff] }
 0xfd2   :  { %2166 = vadd.xlane.f32.xlu1 %v2165_v39  ;;  %v1639_v39 = vld [vmem:[%s5060_s2 + $0x70] sm:$0xff] }
 0xfe3   :  { %3997 = vrot.lane.b32.xlu1 %v4749_v46, %s4164_s28 }
 0xfe7   :  { %3992 = vrot.lane.b32.xlu0 %v4737_v38, %s4164_s28  ;;  %4002 = vrot.lane.b32.xlu1 %v4001_v4, %s4165_s29 }
 0xfeb   :  { %4007 = vrot.lane.b32.xlu0 %v4006_v2, %s4165_s29  ;;  %2496 = vrot.lane.b32.xlu1 %v4725_v26, %s4165_s29 }
0x1059   :  { %v2161_v6 = vpop.xlane.xlu1 %2160 }
0x105a   :  { %v2158_v8 = vpop.xlane.xlu0 %2157 }
0x105b   :  { %4117 = vrcp.f32 %v2158_v8 }
0x105c   :  { %4119 = vrcp.f32 %v2161_v6  ;;  %v1640_v6 = vld [vmem:[%s5060_s2 + $0x78] sm:$0xff] }
0x105d   :  { %v4016_v8 = vpack.i.bf16 %v1640_v6, %v1639_v39 }
0x105e   :  { %v2164_v46 = vpop.xlane.xlu0 %2163 }
0x105f   :  { %v2167_v45 = vpop.xlane.xlu1 %2166  ;;  %4121 = vrcp.f32 %v2164_v46  ;;  %v3857_v46 = vpack.c.bf16 %v1640_v6, %v1639_v39 }
0x1060   :  { %4123 = vrcp.f32 %v2167_v45 }
0x1062   :  { %v3993_v38 = vpop.permute.xlu0 %3992 }
0x1063   :  { %v3995_v11 = vunpack.i.h.bf16 %v3993_v38  ;;  %v3994_v34 = vunpack.i.l.bf16 %v3993_v38  ;;  %v3998_v1 = vpop.permute.xlu1 %3997 }
0x1064   :  { %v4000_v43 = vunpack.i.h.bf16 %v3998_v1  ;;  %v3999_v10 = vunpack.i.l.bf16 %v3998_v1 }
0x1065   :  { %v4118_v12 = vpop.eup %4117  ;;  %v3837_v9 = vpack.c.bf16 %v3995_v11, %v3994_v34 }
0x1066   :  { %v2172_v15 = vmul.f32 %v4118_v12, %v4112_v54  ;;  %v3841_v18 = vpack.c.bf16 %v4000_v43, %v3999_v10  ;;  %v4008_v23 = vpop.permute.xlu0 %4007  ;;  %v4120_v0 = vpop.eup %4119 }
0x1067   :  { %3838 = vmatprep.subr.bf16.mxu1 %v3837_v9  ;;  %v4003_v26 = vpop.permute.xlu1 %4002  ;;  %v4010_v28 = vunpack.i.h.bf16 %v4008_v23  ;;  %v4009_v25 = vunpack.i.l.bf16 %v4008_v23  ;;  %v2173_v60 = vmul.f32 %v4120_v0, %v4110_v57 }
0x1068   :  { %3840 = vmatpush3.bf16.msra.mxu1 %v3837_v9  ;;  %3621 = vmatprep.mubr.msk.f32.mxu1 %vm154_vm4, %v2172_v15  ;;  %v4005_v24 = vunpack.i.h.bf16 %v4003_v26  ;;  %v4004_v16 = vunpack.i.l.bf16 %v4003_v26 }
0x1069   :  { %3842 = vmatprep.subr.bf16.mxu1 %v3841_v18  ;;  %v4122_v32 = vpop.eup %4121  ;;  %v3849_v44 = vpack.c.bf16 %v4010_v28, %v4009_v25 }
0x106a   :  { %v3845_v17 = vpack.c.bf16 %v4005_v24, %v4004_v16  ;;  %v4124_v56 = vpop.eup %4123  ;;  %v2174_v41 = vmul.f32 %v4122_v32, %v4114_v30 }
0x106b   :  { %v2175_v35 = vmul.f32 %v4124_v56, %v4116_v62  ;;  %v2497_v53 = vpop.permute.xlu1 %2496 }
0x106c   :  { %3844 = vmatpush3.bf16.msra.mxu1 %v3841_v18 }
0x106d   :  { %3846 = vmatprep.subr.bf16.mxu1 %v3845_v17 }
0x106f   :  { %3622 = vmatmul.mubr.msk.f32.vlgmr.msra.gmra.mrb[28].mxu1 %vm154_vm4, %v2173_v60 }
0x1070   :  { %3624 = vmatprep.mubr.msk.f32.mxu1 %vm154_vm4, %v2174_v41  ;;  %3848 = vmatpush3.bf16.msra.mxu1 %v3845_v17 }
0x1071   :  { %3850 = vmatprep.subr.bf16.mxu1 %v3849_v44 }
0x1073   :  { %3625 = vmatmul.mubr.msk.f32.gmra.mrb[30].mxu1 %vm154_vm4, %v2175_v35 }
0x1142   :  { %v3623_v36 = vpop.f32.mrb[28].mxu1 }
0x1143   :  { %v2266_v21 = vpop.f32.mrb[29].mxu1 }
0x1144   :  { %3631 = vmatprep.mubr.msk.f32.mxu1 %vm395_vm5, %v2266_v21 }
0x1145   :  { %3632 = vmatmul.mubr.msk.f32.vlgmr.msra.gmra.mrb[32].mxu1 %vm395_vm5, %v3623_v36 }
0x1146   :  { %3852 = vmatpush3.bf16.msra.mxu1 %v3849_v44  ;;  %v3626_v59 = vpop.f32.mrb[30].mxu1 }
0x1147   :  { %v2276_v40 = vpop.f32.mrb[31].mxu1 }
0x1148   :  { %3634 = vmatprep.mubr.msk.f32.mxu1 %vm395_vm5, %v2276_v40 }
0x1149   :  { %3635 = vmatmul.mubr.msk.f32.gmra.mrb[34].mxu1 %vm395_vm5, %v3626_v59 }
0x114a   :  { %3641 = vmatprep.mubr.msk.f32.mxu1 %vm395_vm5, %v4813_v63 }
0x114d   :  { %3642 = vmatmul.mubr.msk.f32.vlgmr.msra.gmra.mrb[32].mxu1 %vm395_vm5, %v4811_v14 }
0x114e   :  { %3644 = vmatprep.mubr.msk.f32.mxu1 %vm395_vm5, %v4817_v13 }
0x1151   :  { %3645 = vmatmul.mubr.msk.f32.gmra.mrb[34].mxu1 %vm395_vm5, %v4815_v5 }
0x1220   :  { %v3643_v48 = vpop.f32.mrb[32].mxu1 }
0x1221   :  { %v2500_v33 = vadd.f32 %v3643_v48, %v2497_v53  ;;  %v2476_v49 = vpop.f32.mrb[33].mxu1 }
0x1222   :  { %v2499_v50 = vadd.f32 %v2497_v53, %v2476_v49 }
0x1223   :  { %v4860_v29 = vadd.f32 %v2500_v33, %v4706_v19 }
0x1224   :  { %v4863_v51 = vadd.f32 %v2499_v50, %v4704_v31  ;;  %v3646_v63 = vpop.f32.mrb[34].mxu1 }
0x1225   :  { %v2486_v37 = vpop.f32.mrb[35].mxu1  ;;  %v2510_v14 = vsel %vm154_vm4, %v4860_v29, 0.0  ;;  %v2524_v7 = vmul.f32 %v4860_v29, %v4860_v29  ;;  %v2502_v58 = vadd.f32 %v3646_v63, %v2497_v53 }
0x1226   :  { %v2501_v13 = vadd.f32 %v2497_v53, %v2486_v37  ;;  %2511 = vadd.xlane.f32.xlu1 %v2510_v14  ;;  %v2507_v5 = vsel %vm154_vm4, %v4863_v51, 0.0  ;;  %v2523_v3 = vmul.f32 %v4863_v51, %v4863_v51  ;;  %v3214_v14 = vld [vmem:[%s5059_s3 + $0xa7] ss:$0 sm:$0xff] }
0x1227   :  { %2508 = vadd.xlane.f32.xlu0 %v2507_v5  ;;  %v2530_v31 = vsel %vm154_vm4, %v2524_v7, 0.0  ;;  %v4882_v54 = vadd.f32 %v2502_v58, %v4716_v55  ;;  %v1637_v55 = vld [vmem:[%s5060_s2 + $0x60] sm:$0xff] }
0x1228   :  { %v4872_v19 = vadd.f32 %v2501_v13, %v4714_v27  ;;  %v2527_v27 = vsel %vm154_vm4, %v2523_v3, 0.0  ;;  %v4011_v4 = vpack.i.bf16 %v1638_v22, %v1637_v55  ;;  %v3853_v2 = vpack.c.bf16 %v1638_v22, %v1637_v55 }
0x1229   :  { %v2516_v20 = vsel %vm154_vm4, %v4882_v54, 0.0  ;;  %v2526_v30 = vmul.f32 %v4882_v54, %v4882_v54 }
0x122a   :  { %v2513_v42 = vsel %vm154_vm4, %v4872_v19, 0.0  ;;  %v2525_v57 = vmul.f32 %v4872_v19, %v4872_v19  ;;  %3854 = vmatprep.subr.bf16.mxu0 %v3853_v2 }
0x122b   :  { %2531 = vadd.xlane.f32.xlu0 %v2530_v31  ;;  %2514 = vadd.xlane.f32.xlu1 %v2513_v42  ;;  %v2536_v62 = vsel %vm154_vm4, %v2526_v30, 0.0 }
0x122c   :  { %v2533_v52 = vsel %vm154_vm4, %v2525_v57, 0.0  ;;  %3856 = vmatpush3.bf16.msra.mxu0 %v3853_v2 }
0x122d   :  { %3858 = vmatprep.subr.bf16.mxu0 %v3857_v46 }
0x122f   :  { %2528 = vadd.xlane.f32.xlu0 %v2527_v27  ;;  %2534 = vadd.xlane.f32.xlu1 %v2533_v52 }
0x1230   :  { %3860 = vmatpush3.bf16.msra.mxu0 %v3857_v46 }
0x1233   :  { %2517 = vadd.xlane.f32.xlu0 %v2516_v20 }
0x1237   :  { %2537 = vadd.xlane.f32.xlu0 %v2536_v62 }
0x1240   :  { %4012 = vrot.lane.b32.xlu1 %v4011_v4, %s4163_s1 }
0x124d   :  { %4017 = vrot.lane.b32.xlu0 %v4016_v8, %s4163_s1 }
0x12b3   :  { %v2512_v45 = vpop.xlane.xlu1 %2511 }
0x12b4   :  { %v2509_v38 = vpop.xlane.xlu0 %2508  ;;  %v2520_v11 = vmul.f32 0.03125, %v2512_v45  ;;  %v3216_v45 = vld [vmem:[%s5060_s2 + $0xa3] ss:$0 sm:$0xff] }
0x12b5   :  { %v2519_v34 = vmul.f32 0.03125, %v2509_v38 }
0x12b6   :  { %v2544_v10 = vmul.f32 %v2520_v11, %v2520_v11  ;;  %v2556_v49 = vsub.f32 %v4860_v29, %v2520_v11  ;;  %v3215_v29 = vld [vmem:[%s5059_s3 + $0xa8] ss:$0 sm:$0xff] }
0x12b7   :  { %v2543_v18 = vmul.f32 %v2519_v34, %v2519_v34  ;;  %v2555_v37 = vsub.f32 %v4863_v51, %v2519_v34 }
0x12b8   :  { %v2532_v1 = vpop.xlane.xlu0 %2531  ;;  %v2515_v43 = vpop.xlane.xlu1 %2514 }
0x12b9   :  { %v2540_v12 = vmul.f32 0.03125, %v2532_v1  ;;  %v2521_v9 = vmul.f32 0.03125, %v2515_v43 }
0x12bb   :  { %v2548_v15 = vsub.f32 %v2540_v12, %v2544_v10  ;;  %v2545_v16 = vmul.f32 %v2521_v9, %v2521_v9  ;;  %v2557_v5 = vsub.f32 %v4872_v19, %v2521_v9 }
0x12bc   :  { %v2529_v26 = vpop.xlane.xlu0 %2528  ;;  %v2535_v23 = vpop.xlane.xlu1 %2534 }
0x12bd   :  { %v2552_v24 = vmax.f32 %v2548_v15, 0.0  ;;  %v2539_v28 = vmul.f32 0.03125, %v2529_v26  ;;  %v2541_v25 = vmul.f32 0.03125, %v2535_v23 }
0x12bf   :  { %v2560_v0 = vadd.f32 1e-12, %v2552_v24  ;;  %v2547_v17 = vsub.f32 %v2539_v28, %v2543_v18  ;;  %v2549_v32 = vsub.f32 %v2541_v25, %v2545_v16 }
0x12c0   :  { %v2518_v60 = vpop.xlane.xlu0 %2517 }
0x12c1   :  { %4125 = vrsqrt.f32 %v2560_v0  ;;  %v2551_v44 = vmax.f32 %v2547_v17, 0.0  ;;  %v2553_v56 = vmax.f32 %v2549_v32, 0.0  ;;  %v2522_v41 = vmul.f32 0.03125, %v2518_v60 }
0x12c3   :  { %v2559_v35 = vadd.f32 1e-12, %v2551_v44  ;;  %v2561_v36 = vadd.f32 1e-12, %v2553_v56  ;;  %v2546_v59 = vmul.f32 %v2522_v41, %v2522_v41  ;;  %v2558_v52 = vsub.f32 %v4882_v54, %v2522_v41  ;;  %v4013_v54 = vpop.permute.xlu1 %4012 }
0x12c4   :  { %v2538_v21 = vpop.xlane.xlu0 %2537  ;;  %v4015_v22 = vunpack.i.h.bf16 %v4013_v54  ;;  %v4014_v39 = vunpack.i.l.bf16 %v4013_v54 }
0x12c5   :  { %4127 = vrsqrt.f32 %v2559_v35  ;;  %v2542_v40 = vmul.f32 0.03125, %v2538_v21 }
0x12c6   :  { %4129 = vrsqrt.f32 %v2561_v36  ;;  %v3861_v4 = vpack.c.bf16 %v4015_v22, %v4014_v39 }
0x12c7   :  { %v2550_v53 = vsub.f32 %v2542_v40, %v2546_v59 }
0x12c8   :  { %3863 = vmatprep.subr.msk.bf16.mxu0 %vm4582_vm12, %v3861_v4  ;;  %v4018_v2 = vpop.permute.xlu0 %4017 }
0x12c9   :  { %v2554_v48 = vmax.f32 %v2550_v53, 0.0  ;;  %v4020_v6 = vunpack.i.h.bf16 %v4018_v2  ;;  %v4019_v8 = vunpack.i.l.bf16 %v4018_v2 }
0x12cb   :  { %v4126_v33 = vpop.eup %4125  ;;  %v2562_v50 = vadd.f32 1e-12, %v2554_v48  ;;  %v3867_v46 = vpack.c.bf16 %v4020_v6, %v4019_v8 }
0x12cc   :  { %v2568_v63 = vmul.f32 %v4126_v33, %v2556_v49 }
0x12cd   :  { %4131 = vrsqrt.f32 %v2562_v50 }
0x12ce   :  { %v2576_v31 = vmul.f32 %v3214_v14, %v2568_v63 }
0x12cf   :  { %v4128_v13 = vpop.eup %4127 }
0x12d0   :  { %v4130_v7 = vpop.eup %4129  ;;  %v2567_v58 = vmul.f32 %v4128_v13, %v2555_v37  ;;  %v4916_v51 = vadd.f32 %v3215_v29, %v2576_v31 }
0x12d1   :  { %v2569_v42 = vmul.f32 %v4130_v7, %v2557_v5 }
0x12d2   :  { %v2575_v3 = vmul.f32 %v3214_v14, %v2567_v58 }
0x12d3   :  { %v2577_v57 = vmul.f32 %v3214_v14, %v2569_v42 }
0x12d4   :  { %v4914_v27 = vadd.f32 %v3215_v29, %v2575_v3 }
0x12d5   :  { %v4921_v19 = vadd.f32 %v3215_v29, %v2577_v57 }
0x12d6   :  { %3655 = vmatprep.mubr.msk.f32.mxu0 %vm154_vm4, %v4914_v27 }
0x12d7   :  { %v4132_v20 = vpop.eup %4131  ;;  %3656 = vmatmul.mubr.msk.f32.vlgmr.msra.gmra.mrb[24].mxu0 %vm154_vm4, %v4916_v51 }
0x12d8   :  { %3658 = vmatprep.mubr.msk.f32.mxu0 %vm154_vm4, %v4921_v19  ;;  %v2570_v30 = vmul.f32 %v4132_v20, %v2558_v52  ;;  %3866 = vmatpush3.bf16.xpose.msk.msra.mxu0 %vm4582_vm12, %v3861_v4 }
0x12d9   :  { %3869 = vmatprep.subr.msk.bf16.mxu0 %vm4582_vm12, %v3867_v46 }
0x12da   :  { %v2578_v62 = vmul.f32 %v3214_v14, %v2570_v30 }
0x12dc   :  { %v4927_v55 = vadd.f32 %v3215_v29, %v2578_v62 }
0x12de   :  { %3659 = vmatmul.mubr.msk.f32.gmra.mrb[26].mxu0 %vm154_vm4, %v4927_v55 }
0x12e0   :  { %3872 = vmatpush3.bf16.xpose.msk.msra.mxu0 %vm4582_vm12, %v3867_v46 }
0x13aa   :  { %v3657_v38 = vpop.f32.mrb[24].mxu0 }
0x13ab   :  { %v4942_v11 = vadd.f32 %v3657_v38, %v3216_v45  ;;  %v2669_v34 = vpop.f32.mrb[25].mxu0 }
0x13ac   :  { %v4944_v1 = vadd.f32 %v3216_v45, %v2669_v34 }
0x13ad   :  { %v4947_v43 = vmul.f32 0.70710677, %v4942_v11 }
0x13ae   :  { %v4950_v10 = vmul.f32 0.70710677, %v4944_v1 }
0x13af   :  { %v2705_v12 = vand.u32 2147483647, %v4947_v43  ;;  %vm2697_vm1 = vcmp.ge.f32.partialorder %v4947_v43, 0.0 }
0x13b0   :  { %v2704_v47 = vand.u32 2147483647, %v4950_v10  ;;  %vm2696_vm2 = vcmp.ge.f32.partialorder %v4950_v10, 0.0  ;;  %v2688_v10 = vmul.f32 0.5, %v4944_v1 }
0x13b1   :  { %v2709_v9 = vmul.f32 0.3275911, %v2705_v12  ;;  %v3660_v15 = vpop.f32.mrb[26].mxu0  ;;  %v2757_v41 = vsub.f32 0.0, %v2705_v12 }
0x13b2   :  { %v2708_v18 = vmul.f32 0.3275911, %v2704_v47  ;;  %v4954_v26 = vadd.f32 %v3660_v15, %v3216_v45  ;;  %v2679_v23 = vpop.f32.mrb[27].mxu0  ;;  %v2756_v36 = vsub.f32 0.0, %v2704_v47 }
0x13b3   :  { %v2713_v24 = vadd.f32 1.0, %v2709_v9  ;;  %v4956_v16 = vadd.f32 %v3216_v45, %v2679_v23  ;;  %v2761_v59 = vmul.f32 %v2757_v41, %v2705_v12 }
0x13b4   :  { %v2712_v28 = vadd.f32 1.0, %v2708_v18  ;;  %v4959_v25 = vmul.f32 0.70710677, %v4954_v26  ;;  %v2760_v48 = vmul.f32 %v2756_v36, %v2704_v47 }
0x13b5   :  { %4133 = vrcp.f32 %v2713_v24  ;;  %v4962_v0 = vmul.f32 0.70710677, %v4956_v16  ;;  %v2766_v63 = vmul.f32 1.442695, %v2761_v59  ;;  %v2701_v59 = vsel %vm2697_vm1, 1.0, %v4166_v61 }
0x13b6   :  { %4135 = vrcp.f32 %v2712_v28  ;;  %v2707_v17 = vand.u32 2147483647, %v4959_v25  ;;  %v2764_v5 = vmul.f32 1.442695, %v2760_v48  ;;  %vm2699_vm3 = vcmp.ge.f32.partialorder %v4959_v25, 0.0 }
0x13b7   :  { %v2706_v32 = vand.u32 2147483647, %v4962_v0  ;;  %vm2698_vm5 = vcmp.ge.f32.partialorder %v4962_v0, 0.0  ;;  %v2691_v0 = vmul.f32 0.5, %v4954_v26 }
0x13b8   :  { %v2711_v60 = vmul.f32 0.3275911, %v2707_v17  ;;  %v2759_v50 = vsub.f32 0.0, %v2707_v17 }
0x13b9   :  { %v2710_v44 = vmul.f32 0.3275911, %v2706_v32  ;;  %v2758_v14 = vsub.f32 0.0, %v2706_v32 }
0x13ba   :  { %v2715_v56 = vadd.f32 1.0, %v2711_v60  ;;  %v2763_v42 = vmul.f32 %v2759_v50, %v2707_v17 }
0x13bb   :  { %v2714_v35 = vadd.f32 1.0, %v2710_v44  ;;  %v2762_v52 = vmul.f32 %v2758_v14, %v2706_v32 }
0x13bc   :  { %4137 = vrcp.f32 %v2715_v56  ;;  %v2770_v39 = vmul.f32 1.442695, %v2763_v42 }
0x13bd   :  { %4139 = vrcp.f32 %v2714_v35  ;;  %v2768_v8 = vmul.f32 1.442695, %v2762_v52 }
0x13be   :  { %4141 = vpow2.f32 %v2766_v63 }
0x13bf   :  { %v4134_v21 = vpop.eup %4133  ;;  %4143 = vpow2.f32 %v2764_v5 }
0x13c0   :  { %v4136_v40 = vpop.eup %4135  ;;  %v2721_v53 = vmul.f32 1.0614054, %v4134_v21  ;;  %4145 = vpow2.f32 %v2770_v39 }
0x13c1   :  { %v2720_v33 = vmul.f32 1.0614054, %v4136_v40  ;;  %4147 = vpow2.f32 %v2768_v8 }
0x13c2   :  { %v2725_v49 = vadd.f32 -1.4531521, %v2721_v53 }
0x13c3   :  { %v2724_v37 = vadd.f32 -1.4531521, %v2720_v33  ;;  %v2700_v33 = vsel %vm2696_vm2, 1.0, %v4166_v61 }
0x13c4   :  { %v2729_v13 = vmul.f32 %v4134_v21, %v2725_v49 }
0x13c5   :  { %v2728_v7 = vmul.f32 %v4136_v40, %v2724_v37 }
0x13c6   :  { %v4138_v58 = vpop.eup %4137  ;;  %v2733_v31 = vadd.f32 1.4214138, %v2729_v13 }
0x13c7   :  { %v4140_v29 = vpop.eup %4139  ;;  %v2732_v3 = vadd.f32 1.4214138, %v2728_v7  ;;  %v2723_v57 = vmul.f32 1.0614054, %v4138_v58  ;;  %v2689_v7 = vmul.f32 0.5, %v4942_v11  ;;  %v2690_v11 = vmul.f32 0.5, %v4956_v16 }
0x13c8   :  { %v2737_v20 = vmul.f32 %v4134_v21, %v2733_v31  ;;  %v2722_v30 = vmul.f32 1.0614054, %v4140_v29  ;;  %v4142_v24 = vpop.eup %4141 }
0x13c9   :  { %v2736_v62 = vmul.f32 %v4136_v40, %v2732_v3  ;;  %v2727_v54 = vadd.f32 -1.4531521, %v2723_v57  ;;  %v4144_v32 = vpop.eup %4143 }
0x13ca   :  { %v2741_v22 = vadd.f32 -0.28449672, %v2737_v20  ;;  %v2726_v4 = vadd.f32 -1.4531521, %v2722_v30  ;;  %v4146_v63 = vpop.eup %4145 }
0x13cb   :  { %v2740_v2 = vadd.f32 -0.28449672, %v2736_v62  ;;  %v2731_v6 = vmul.f32 %v4138_v58, %v2727_v54  ;;  %v4148_v14 = vpop.eup %4147 }
0x13cc   :  { %v2745_v46 = vmul.f32 %v4134_v21, %v2741_v22  ;;  %v2730_v45 = vmul.f32 %v4140_v29, %v2726_v4 }
0x13cd   :  { %v2744_v38 = vmul.f32 %v4136_v40, %v2740_v2  ;;  %v2735_v34 = vadd.f32 1.4214138, %v2731_v6 }
0x13ce   :  { %v2749_v12 = vadd.f32 0.2548296, %v2745_v46  ;;  %v2734_v47 = vadd.f32 1.4214138, %v2730_v45 }
0x13cf   :  { %v2748_v9 = vadd.f32 0.2548296, %v2744_v38  ;;  %v2739_v15 = vmul.f32 %v4138_v58, %v2735_v34 }
0x13d0   :  { %v2753_v18 = vmul.f32 %v4134_v21, %v2749_v12  ;;  %v2738_v23 = vmul.f32 %v4140_v29, %v2734_v47 }
0x13d1   :  { %v2752_v28 = vmul.f32 %v4136_v40, %v2748_v9  ;;  %v2743_v17 = vadd.f32 -0.28449672, %v2739_v15 }
0x13d2   :  { %v2773_v60 = vmul.f32 %v4142_v24, %v2753_v18  ;;  %v2742_v44 = vadd.f32 -0.28449672, %v2738_v23 }
0x13d3   :  { %v2772_v56 = vmul.f32 %v4144_v32, %v2752_v28  ;;  %v2747_v41 = vmul.f32 %v4138_v58, %v2743_v17  ;;  %v2997_v17 = vld [vmem:[%s5060_s2 + $0x80] sm:$0xff]  ;;  %v2998_v32 = vld [vmem:[%s5060_s2 + $0x88] sm:$0xff] }
0x13d4   :  { %v2777_v35 = vsub.f32 1.0, %v2773_v60  ;;  %v2746_v36 = vmul.f32 %v4140_v29, %v2742_v44  ;;  %v3873_v60 = vpack.c.bf16 %v2998_v32, %v2997_v17  ;;  %v2999_v44 = vld [vmem:[%s5060_s2 + $0x90] sm:$0xff] }
0x13d5   :  { %v2776_v53 = vsub.f32 1.0, %v2772_v56  ;;  %v2751_v48 = vadd.f32 0.2548296, %v2747_v41  ;;  %v3000_v56 = vld [vmem:[%s5060_s2 + $0x98] sm:$0xff] }
0x13d6   :  { %v2781_v21 = vmul.f32 %v2777_v35, %v2701_v59  ;;  %v2750_v40 = vadd.f32 0.2548296, %v2746_v36  ;;  %3874 = vmatprep.subr.bf16.mxu1 %v3873_v60  ;;  %v3877_v41 = vpack.c.bf16 %v3000_v56, %v2999_v44 }
0x13d7   :  { %v2780_v49 = vmul.f32 %v2776_v53, %v2700_v33  ;;  %v2755_v50 = vmul.f32 %v4138_v58, %v2751_v48  ;;  %v2703_v58 = vsel %vm2699_vm3, 1.0, %v4166_v61  ;;  %3876 = vmatpush3.bf16.msra.mxu1 %v3873_v60 }
0x13d8   :  { %v2785_v43 = vadd.f32 1.0, %v2781_v21  ;;  %v2754_v37 = vmul.f32 %v4140_v29, %v2750_v40  ;;  %v2702_v29 = vsel %vm2698_vm5, 1.0, %v4166_v61  ;;  %v3221_v61 = vld [vmem:[%s5059_s3 + $0xab] ss:$0 sm:$0xff]  ;;  %3878 = vmatprep.subr.bf16.mxu1 %v3877_v41 }
0x13d9   :  { %v2784_v13 = vadd.f32 1.0, %v2780_v49  ;;  %v2775_v5 = vmul.f32 %v4146_v63, %v2755_v50 }
0x13da   :  { %v2774_v31 = vmul.f32 %v4148_v14, %v2754_v37  ;;  %v2789_v57 = vmul.f32 %v2785_v43, %v2689_v7 }
0x13db   :  { %v2788_v42 = vmul.f32 %v2784_v13, %v2688_v10  ;;  %v2779_v3 = vsub.f32 1.0, %v2775_v5  ;;  %3880 = vmatpush3.bf16.msra.mxu1 %v3877_v41 }
0x13dc   :  { %v2778_v52 = vsub.f32 1.0, %v2774_v31 }
0x13dd   :  { %v2783_v20 = vmul.f32 %v2779_v3, %v2703_v58  ;;  %3669 = vmatprep.mubr.msk.f32.mxu0 %vm1443_vm11, %v2788_v42 }
0x13de   :  { %v2782_v1 = vmul.f32 %v2778_v52, %v2702_v29  ;;  %3670 = vmatmul.mubr.msk.f32.vlgmr.msra.gmra.mrb[28].mxu0 %vm1443_vm11, %v2789_v57 }
0x13df   :  { %v2787_v25 = vadd.f32 1.0, %v2783_v20 }
0x13e0   :  { %v2786_v30 = vadd.f32 1.0, %v2782_v1 }
0x13e1   :  { %v2791_v54 = vmul.f32 %v2787_v25, %v2691_v0 }
0x13e2   :  { %v2790_v62 = vmul.f32 %v2786_v30, %v2690_v11 }
0x13e4   :  { %3672 = vmatprep.mubr.msk.f32.mxu0 %vm1443_vm11, %v2790_v62 }
0x13e5   :  { %3673 = vmatmul.mubr.msk.f32.gmra.mrb[30].mxu0 %vm1443_vm11, %v2791_v54 }
0x14b1   :  { %v3671_v22 = vpop.f32.mrb[28].mxu0 }
0x14b2   :  { %v2900_v39 = vadd.f32 %v3671_v22, %v3221_v61  ;;  %v2894_v4 = vpop.f32.mrb[29].mxu0 }
0x14b3   :  { %v2895_v2 = vadd.f32 %v3221_v61, %v2894_v4 }
0x14b4   :  { %v4986_v6 = vadd.f32 %v2900_v39, %v4916_v51  ;;  %v3230_v39 = vld [vmem:[%s5059_s3 + $0xa9] ss:$0 sm:$0xff] }
0x14b5   :  { %v4989_v16 = vadd.f32 %v2895_v2, %v4914_v27 }
0x14b6   :  { %v2920_v26 = vsel %vm154_vm4, %v4986_v6, 0.0  ;;  %v2934_v8 = vmul.f32 %v4986_v6, %v4986_v6 }
0x14b7   :  { %2921 = vadd.xlane.f32.xlu0 %v2920_v26  ;;  %v2917_v46 = vsel %vm154_vm4, %v4989_v16, 0.0  ;;  %v2933_v45 = vmul.f32 %v4989_v16, %v4989_v16 }
0x14b8   :  { %v3674_v38 = vpop.f32.mrb[30].mxu0  ;;  %2918 = vadd.xlane.f32.xlu1 %v2917_v46  ;;  %v2940_v27 = vsel %vm154_vm4, %v2934_v8, 0.0  ;;  %v3231_v8 = vld [vmem:[%s5059_s3 + $0xaa] ss:$0 sm:$0xff] }
0x14b9   :  { %v2910_v51 = vadd.f32 %v3674_v38, %v3221_v61  ;;  %v2904_v34 = vpop.f32.mrb[31].mxu0  ;;  %v2937_v9 = vsel %vm154_vm4, %v2933_v45, 0.0 }
0x14ba   :  { %v2905_v12 = vadd.f32 %v3221_v61, %v2904_v34 }
0x14bb   :  { %v5001_v47 = vadd.f32 %v2910_v51, %v4927_v55  ;;  %2941 = vadd.xlane.f32.xlu0 %v2940_v27 }
0x14bc   :  { %v5005_v15 = vadd.f32 %v2905_v12, %v4921_v19  ;;  %2938 = vadd.xlane.f32.xlu1 %v2937_v9 }
0x14bd   :  { %v2926_v18 = vsel %vm154_vm4, %v5001_v47, 0.0  ;;  %v2936_v24 = vmul.f32 %v5001_v47, %v5001_v47 }
0x14be   :  { %v2923_v23 = vsel %vm154_vm4, %v5005_v15, 0.0  ;;  %v2935_v55 = vmul.f32 %v5005_v15, %v5005_v15 }
0x14bf   :  { %2927 = vadd.xlane.f32.xlu0 %v2926_v18  ;;  %v2946_v28 = vsel %vm154_vm4, %v2936_v24, 0.0 }
0x14c0   :  { %2924 = vadd.xlane.f32.xlu1 %v2923_v23  ;;  %v2943_v19 = vsel %vm154_vm4, %v2935_v55, 0.0 }
0x14c3   :  { %2947 = vadd.xlane.f32.xlu0 %v2946_v28 }
0x14c4   :  { %2944 = vadd.xlane.f32.xlu1 %v2943_v19 }
0x1544   :  { %v2922_v35 = vpop.xlane.xlu0 %2921 }
0x1545   :  { %v2930_v36 = vmul.f32 0.03125, %v2922_v35  ;;  %v2919_v59 = vpop.xlane.xlu1 %2918 }
0x1546   :  { %v2929_v53 = vmul.f32 0.03125, %v2919_v59 }
0x1547   :  { %v2954_v21 = vmul.f32 %v2930_v36, %v2930_v36  ;;  %v2966_v54 = vsub.f32 %v4986_v6, %v2930_v36 }
0x1548   :  { %v2942_v48 = vpop.xlane.xlu0 %2941  ;;  %v2953_v49 = vmul.f32 %v2929_v53, %v2929_v53  ;;  %v2965_v22 = vsub.f32 %v4989_v16, %v2929_v53 }
0x1549   :  { %v2950_v33 = vmul.f32 0.03125, %v2942_v48  ;;  %v2939_v40 = vpop.xlane.xlu1 %2938 }
0x154a   :  { %v2949_v50 = vmul.f32 0.03125, %v2939_v40 }
0x154b   :  { %v2958_v63 = vsub.f32 %v2950_v33, %v2954_v21 }
0x154c   :  { %v2957_v43 = vsub.f32 %v2949_v50, %v2953_v49  ;;  %v2928_v37 = vpop.xlane.xlu0 %2927 }
0x154d   :  { %v2962_v14 = vmax.f32 %v2958_v63, 0.0  ;;  %v2932_v10 = vmul.f32 0.03125, %v2928_v37  ;;  %v2925_v13 = vpop.xlane.xlu1 %2924 }
0x154e   :  { %v2961_v5 = vmax.f32 %v2957_v43, 0.0  ;;  %v2931_v7 = vmul.f32 0.03125, %v2925_v13 }
0x154f   :  { %v2970_v31 = vadd.f32 1e-12, %v2962_v14  ;;  %v2956_v57 = vmul.f32 %v2932_v10, %v2932_v10  ;;  %v2968_v6 = vsub.f32 %v5001_v47, %v2932_v10  ;;  %v3232_v47 = vld [vmem:[%s5060_s2 + $0xa4] ss:$0 sm:$0xff] }
0x1550   :  { %v2969_v42 = vadd.f32 1e-12, %v2961_v5  ;;  %v2948_v3 = vpop.xlane.xlu0 %2947  ;;  %v2955_v20 = vmul.f32 %v2931_v7, %v2931_v7  ;;  %v2967_v16 = vsub.f32 %v5005_v15, %v2931_v7 }
0x1551   :  { %4149 = vrsqrt.f32 %v2970_v31  ;;  %v2952_v58 = vmul.f32 0.03125, %v2948_v3  ;;  %v2945_v52 = vpop.xlane.xlu1 %2944 }
0x1552   :  { %4151 = vrsqrt.f32 %v2969_v42  ;;  %v2951_v29 = vmul.f32 0.03125, %v2945_v52 }
0x1553   :  { %v2960_v1 = vsub.f32 %v2952_v58, %v2956_v57 }
0x1554   :  { %v2959_v25 = vsub.f32 %v2951_v29, %v2955_v20 }
0x1555   :  { %v2964_v11 = vmax.f32 %v2960_v1, 0.0 }
0x1556   :  { %v2963_v30 = vmax.f32 %v2959_v25, 0.0 }
0x1557   :  { %v2972_v0 = vadd.f32 1e-12, %v2964_v11 }
0x1558   :  { %v2971_v62 = vadd.f32 1e-12, %v2963_v30 }
0x1559   :  { %4153 = vrsqrt.f32 %v2972_v0 }
0x155a   :  { %4155 = vrsqrt.f32 %v2971_v62 }
0x155b   :  { %v4150_v61 = vpop.eup %4149 }
0x155c   :  { %v4152_v4 = vpop.eup %4151  ;;  %v2978_v2 = vmul.f32 %v4150_v61, %v2966_v54 }
0x155d   :  { %v2977_v26 = vmul.f32 %v4152_v4, %v2965_v22 }
0x155e   :  { %v2986_v46 = vmul.f32 %v3230_v39, %v2978_v2 }
0x155f   :  { %v2985_v45 = vmul.f32 %v3230_v39, %v2977_v26 }
0x1560   :  { %v2994_v51 = vadd.f32 %v3231_v8, %v2986_v46 }
0x1561   :  { %v2993_v38 = vadd.f32 %v3231_v8, %v2985_v45 }
0x1563   :  { %v4154_v34 = vpop.eup %4153  ;;  %3683 = vmatprep.mubr.msk.f32.mxu1 %vm154_vm4, %v2993_v38 }
0x1564   :  { %v4156_v12 = vpop.eup %4155  ;;  %3684 = vmatmul.mubr.msk.f32.vlgmr.msra.gmra.mrb[36].mxu1 %vm154_vm4, %v2994_v51  ;;  %v2980_v27 = vmul.f32 %v4154_v34, %v2968_v6 }
0x1565   :  { %v2979_v9 = vmul.f32 %v4156_v12, %v2967_v16 }
0x1566   :  { %v2988_v18 = vmul.f32 %v3230_v39, %v2980_v27 }
0x1567   :  { %v2987_v23 = vmul.f32 %v3230_v39, %v2979_v9 }
0x1568   :  { %v2996_v55 = vadd.f32 %v3231_v8, %v2988_v18 }
0x1569   :  { %v2995_v24 = vadd.f32 %v3231_v8, %v2987_v23 }
0x156b   :  { %3686 = vmatprep.mubr.msk.f32.mxu1 %vm154_vm4, %v2995_v24 }
0x156c   :  { %3687 = vmatmul.mubr.msk.f32.gmra.mrb[38].mxu1 %vm154_vm4, %v2996_v55 }
0x1637   :  { %v3685_v15 = vpop.f32.mrb[36].mxu1 }
0x1638   :  { %v3090_v28 = vadd.f32 %v3685_v15, %v3232_v47  ;;  %v3084_v19 = vpop.f32.mrb[37].mxu1 }
0x1639   :  { %v3085_v17 = vadd.f32 %v3232_v47, %v3084_v19 }
0x163a   :  { %3104 = vst [vmem:[%s5062_s4 + $0x8] sm:$0xff] %v3090_v28 }
0x163b   :  { %3103 = vst [vmem:[%s5062_s4] sm:$0xff] %v3085_v17 }
0x163f   :  { %v3688_v32 = vpop.f32.mrb[38].mxu1 }
0x1640   :  { %v3100_v60 = vadd.f32 %v3688_v32, %v3232_v47  ;;  %v3094_v44 = vpop.f32.mrb[39].mxu1 }
0x1641   :  { %v3095_v56 = vadd.f32 %v3232_v47, %v3094_v44 }
0x1642   :  { %3106 = vst [vmem:[%s5062_s4 + $0x18] sm:$0xff] %v3100_v60 }
0x1643   :  { %3105 = vst [vmem:[%s5062_s4 + $0x10] sm:$0xff] %v3095_v56 }

</bundles_post_ra>
